<compile_context>
chip_gen: v5e
topology: v5e:2x2
jax: 0.10.0
libtpu: 0.0.40
codegen_flags: <defaults>
</compile_context>

<pallas_src>
import jax
import jax.numpy as jnp
from jax.experimental import pallas as pl
from jax.experimental.pallas import tpu as pltpu


def _sqrt_kernel(x_ref, o_ref):
    # Pure elementwise sqrt on the whole VMEM tile (VPU/EUP path); mem-bound.
    # Ragged last row-block may read garbage rows; those output rows are
    # masked by Pallas boundary handling, so correctness is unaffected.
    o_ref[...] = jnp.sqrt(x_ref[...])


_TARGET_BLOCK_BYTES = 8 * 1024 * 1024    # ~8 MiB per grid step (good on v6e/v7x, harmless on v5e)
_MIN_GRID_STEPS = 4                      # keep >= 4 steps so both v7x TCs get work
_SMALL_FALLBACK_BYTES = 64 * 1024        # below this, pallas launch overhead dominates
_VMEM_LIMIT_BYTES = 48 * 1024 * 1024     # 2 bufs x (in+out) x 8 MiB = 32 MiB < 48 MiB < 64 MiB (v7x)


def _sublane_multiple(dtype) -> int:
    # Packed-tile second-minor constraint: f32 -> 8, bf16/f16 -> 16, int8/fp8 -> 32.
    itemsize = jnp.dtype(dtype).itemsize
    return max(8, 32 // itemsize)


def _pick_lanes(n: int) -> int:
    # Largest lane-dense width (multiple of 128) that divides n -> aligned fast
    # path (no pad, no slice). Falls back to 128 for the ragged-tail path.
    for lanes in (512, 256, 128):
        if n % lanes == 0:
            return lanes
    return 128


def _pick_tile_rows(rows: int, lanes: int, itemsize: int, sub: int) -> int:
    if rows <= sub:
        # Single block equal to the full array dims (legal even if rows % sub != 0).
        return rows
    # Big streaming tiles, targeting ~_TARGET_BLOCK_BYTES per step.
    target = max(sub, (_TARGET_BLOCK_BYTES // (lanes * itemsize)) // sub * sub)
    # Cap so the grid has >= _MIN_GRID_STEPS steps: lets ("parallel",) shard
    # the work across both TensorCores on v7x instead of collapsing to grid=(1,).
    cap = max(sub, pl.cdiv(pl.cdiv(rows, _MIN_GRID_STEPS), sub) * sub)
    return min(target, cap)


def _sqrt_2d(x2d: jax.Array) -> jax.Array:
    """Pallas sqrt over a (rows, lanes) slab; lanes is a multiple of 128."""
    rows, lanes = x2d.shape
    itemsize = jnp.dtype(x2d.dtype).itemsize
    sub = _sublane_multiple(x2d.dtype)
    tile_rows = _pick_tile_rows(rows, lanes, itemsize, sub)
    grid = (pl.cdiv(rows, tile_rows),)

    return pl.pallas_call(
        _sqrt_kernel,
        out_shape=jax.ShapeDtypeStruct((rows, lanes), x2d.dtype),
        grid_spec=pltpu.PrefetchScalarGridSpec(
            num_scalar_prefetch=0,
            grid=grid,
            in_specs=[pl.BlockSpec((tile_rows, lanes), lambda i: (i, 0))],
            out_specs=pl.BlockSpec((tile_rows, lanes), lambda i: (i, 0)),
        ),
        compiler_params=pltpu.CompilerParams(
            dimension_semantics=("parallel",),
            vmem_limit_bytes=_VMEM_LIMIT_BYTES,
        ),
    )(x2d)


def pallas_sqrt(x: jax.Array) -> jax.Array:
    """Elementwise sqrt via a Pallas TPU kernel. Works for any shape/float dtype."""
    orig_shape = x.shape
    dtype = x.dtype
    n = x.size
    if n == 0:
        return x
    # Non-float inputs: match torch.sqrt semantics (promote to float) via XLA.
    if not jnp.issubdtype(dtype, jnp.floating):
        return jnp.sqrt(x)
    # Tiny tensors: pallas_call fixed launch + pipeline setup overhead dominates;
    # XLA's fused sqrt is strictly faster.
    if n * jnp.dtype(dtype).itemsize < _SMALL_FALLBACK_BYTES:
        return jnp.sqrt(x)

    flat = jnp.ravel(x)
    lanes = _pick_lanes(n)
    n_main = (n // lanes) * lanes

    if n_main == n:
        # Aligned fast path: no pad, no output slice — single HBM stream.
        out_flat = _sqrt_2d(flat.reshape(n // lanes, lanes)).reshape(-1)
    else:
        # Ragged path (n % 128 != 0): kernel on the aligned prefix, tiny tail
        # (< 128 elems) via jnp.sqrt. The prefix slice + concat do cost extra
        # HBM passes, but only for sizes that are not a multiple of 128.
        main = _sqrt_2d(flat[:n_main].reshape(n_main // lanes, lanes)).reshape(-1)
        tail = jnp.sqrt(flat[n_main:])
        out_flat = jnp.concatenate([main, tail])

    return out_flat.reshape(orig_shape)


if __name__ == "__main__":
    key = jax.random.PRNGKey(0)
    k1, k2, k3 = jax.random.split(key, 3)

    # Spec-consistent small NCHW input (sqrt needs non-negative values):
    # served by the small-input fallback (still the correct forward).
    x_small = jax.random.uniform(k1, (2, 4, 16, 16), dtype=jnp.float32,
                                 minval=0.0, maxval=10.0)
    # Larger, 512-aligned input: exercises the aligned multi-step Pallas path
    # (lanes=512, grid of 4 parallel steps).
    x_big = jax.random.uniform(k2, (256, 1024), dtype=jnp.float32,
                               minval=0.0, maxval=10.0)
    # Ragged element count (not a multiple of 128): exercises the tail path.
    x_ragged = jax.random.uniform(k3, (3, 7, 1111), dtype=jnp.float32,
                                  minval=0.0, maxval=10.0)

    ok = True
    for x in (x_small, x_big, x_ragged):
        out = jax.block_until_ready(pallas_sqrt(x))
        ref = jnp.sqrt(x)
        ok &= (out.shape == x.shape) and (out.dtype == x.dtype)
        ok &= bool(jnp.allclose(out, ref, atol=1e-6, rtol=1e-6))
    assert ok
    print("KERNEL_OK")
</pallas_src>

<mosaic_0001>
module attributes {stable_mosaic.version = 11 : i64} {
  func.func @_sqrt_kernel(%arg0: i32, %arg1: memref<128x512xf32, #tpu.memory_space<vmem>>, %arg2: memref<128x512xf32, #tpu.memory_space<vmem>>) attributes {dimension_semantics = [#tpu.dimension_semantics<parallel>], iteration_bounds = array<i64: 4>, scalar_prefetch = 0 : i64, scratch_operands = 0 : i64, tpu.core_type = #tpu.core_type<tc>, window_params = [{transform_indices = @transform_0, window_bounds = array<i64: 128, 512>}, {transform_indices = @transform_1, window_bounds = array<i64: 128, 512>}]} {
    %c0 = arith.constant 0 : index
    %c0_0 = arith.constant 0 : index
    %0 = vector.load %arg1[%c0, %c0_0] : memref<128x512xf32, #tpu.memory_space<vmem>>, vector<128x512xf32>
    %1 = math.sqrt %0 : vector<128x512xf32>
    %c0_1 = arith.constant 0 : index
    %c0_2 = arith.constant 0 : index
    %2 = vector.load %arg2[%c0_1, %c0_2] : memref<128x512xf32, #tpu.memory_space<vmem>>, vector<128x512xf32>
    tpu.vector_store %arg2[%c0_1, %c0_2], %1 {strides = array<i32>} : memref<128x512xf32, #tpu.memory_space<vmem>>, vector<128x512xf32>,
    return
  }
  func.func @transform_0(%arg0: i32) -> (i32, i32) {
    %c0_i32 = arith.constant 0 : i32
    %c0_i32_0 = arith.constant 0 : i32
    return %arg0, %c0_i32 : i32, i32
  }
  func.func @transform_1(%arg0: i32) -> (i32, i32) {
    %c0_i32 = arith.constant 0 : i32
    %c0_i32_0 = arith.constant 0 : i32
    return %arg0, %c0_i32 : i32, i32
  }
}

</mosaic_0001>

<bundles_post_ra>
// kernel: tpu_custom_call.1
= control target key start
LH: loop header
LB: loop body
LE: loop exit
PB: predicated region body
PF: predicated region fallthrough
CT: control target
= control target key end

     0   :  { %6 = vsyncpa [#allocation3], 0  ;;  %s2524_s0 = inlined_call_operand.hbm [shape: f32[512,512], index: 0, kind: input, shape index: {}]   ;;  %s2525_s1 = inlined_call_operand.hbm [shape: f32[512,512], index: 1, kind: output, shape index: {}]  }
   0x1   :  { %8 = vsyncpa [#allocation3 + $0x1], 0 }
   0x2   :  { %9 = vsyncpa [#allocation4], 0 }
   0x3   :  { %11 = vsyncpa [#allocation4 + $0x1], 0  ;;  %s1436_s6 = smov 0   ;;  %s1438_s7 = smov 0  }
   0x4   :  { %s1440_s8 = smov 0   ;;  %s1442_s9 = smov 0  }
   0x5 LB: > { %s1457_s10 = sadd.s32 4294967295, %s1420_s9   ;;  %s1126_s11 = sadd.s32 4294967294, %s1420_s9   ;;  %s1420_s9 = sphi %s1442_s9, %s2534_s9   ;;  %s1416_s8 = sphi %s1440_s8, %s2533_s8   ;;  %s1412_s7 = sphi %s1438_s7, %s2532_s7   ;;  %s1408_s6 = sphi %s1436_s6, %s2531_s6  }
   0x6   : > { %s1461_s12 = sadd.s32 1, %s1420_s9   ;;  %s24_s13 = sadd.s32 1, %s1416_s8 }
   0x7   : > { %s21_s14 = ssub.s32 %s1420_s9, %s1461_s12  ;;  %p31_p0 = scmp.ne.s32.totalorder %s1416_s8, %s1412_s7 }
   0x8   : > { %p22_p1 = scmp.eq.s32.totalorder %s21_s14, 0  ;;  %p32_p2 = scmp.eq.s32.totalorder %s1420_s9, 0 }
   0x9   : > { %p37_p3 = scmp.ne.s32.totalorder %s1412_s7, %s1408_s6  ;;  %p38_p4 = scmp.eq.s32.totalorder %s1457_s10, 0 }
   0xa   : > { %s1473_s15 = scalar_select %p22_p1, %s1416_s8, %s24_s13  }
   0xb   : > { %p1475_p5 = por %p32_p2, %p31_p0  ;;  %p1479_p6 = por %p38_p4, %p37_p3 }
   0xc   : > { %p61_p7 = scmp.eq.s32.totalorder %s1457_s10, 3  ;;  %p67_p8 = scmp.eq.s32.totalorder %s1126_s11, 3 }
   0xd   : > { %p1158_p9 = scmp.lt.s32.totalorder %s1420_s9, 4  ;;  %s87_s20 = sand.u32 1, %s1416_s8  }
   0xe   : > { %p1485_p10 = por %p61_p7, %p31_p0  ;;  %p1489_p11 = por %p67_p8, %p37_p3 }
   0xf   : > { %s1143_s21 = sshll.u32 %s1420_s9, 9  ;;  %s1129_s22 = sshll.u32 %s87_s20, 9 }
  0x10   : > { %s97_s25 = scalar_lea.hbm %s2524_s0, %s1143_s21  ;;  %s91_s27 = scalar_lea.vmem [#allocation2], %s1129_s22 }
  0x11   : > { %s98_s26 = sshll.u32 %s97_s25, 4  ;;  %s100_s28 = sshll.u32 %s91_s27, 4  ;;  %s99_s26 = int_to_ptr.hbm [resolvable:$true] %s98_s26  ;;  %s101_s28 = int_to_ptr.vmem [resolvable:$true] %s100_s28 }
  0x12   : > { %p1500_p12 = pnand %p1158_p9, %p1475_p5  ;;  %p1133_p13 = scmp.ge.s32.totalorder %s1420_s9, 1 }
  0x13   : > { %p108_p0 = scmp.lt.s32.totalorder %s1420_s9, 5  ;;  %s88_s30 = scalar_lea.sflag [#allocation3], %s87_s20 }
  0x14   : > { %s1324_s2 = sshra.s32 %s99_s26, 4  ;;  %p1328_p2 = pneg %p1500_p12  ;;  %s1325_s2 = int_to_ptr.hbm [resolvable:$true] %s1324_s2 }
  0x15   : > { %s1326_s3 = scalar_lea.hbm %s1325_s2, 512  ;;  %s1331_s11 = scalar_lea.hbm %s2524_s0, 2048 }
  0x16   : > { %p1327_p1 = scmp.ne.s32.totalorder %s1325_s2, %s1326_s3  ;;  %p1332_p5 = scmp.lt.s32.totalorder %s1325_s2, %s2524_s0 }
  0x17   : > { %p1333_p7 = scmp.lt.s32.totalorder %s1331_s11, %s1326_s3 }
  0x18   : > { %p1329_p3 = pnand %p1328_p2, %p1327_p1 }
  0x19   : > { %p1334_p8 = por %p1333_p7, %p1332_p5 }
  0x1a   : > { %p1330_p4 = pneg %p1329_p3 }
  0x1c   : > { %p1335_p9 = pnand %p1334_p8, %p1330_p4 }
  0x1e   : > { %1338 = shalt.err (!%p1335_p9)
}
  0x1f   : > { %s1422_s16 = smov 512   ;;  %s1423_s20 = smov 32  }
  0x20   : > { %1153 = dma.hbm_to_vmem [thread:$0]  (!%p1500_p12), %s99_s26, 8192, %s101_s28, %s88_s30, %s1422_s16, %s1422_s16, %s1423_s20  }
  0x21   : > { %p109_p1 = pnand %p1133_p13, %p108_p0 }
  0x22   : > { %s1521_s21 = sand.u32 (!%p109_p1), 1, %s1412_s7  }
  0x23   : > { %112 = sbr.rel (%p109_p1) target bundleno = 243 (0xf3), region = 24  ;;  %s1134_s22 = sshll.u32 (!%p109_p1), %s1521_s21, 9 }
  0x24   : > { %s115_s23 = scalar_lea.sflag (!%p109_p1), [#allocation3], %s1521_s21  ;;  %s1527_s24 = scalar_lea.vmem (!%p109_p1), [#allocation2], %s1134_s22 }
  0x28   : > { %1399 = dma.done.wait (%p1479_p6), %s115_s23, 8192  }
  0x29   : > { %1401 = vsyncadd (%p1479_p6), %s115_s23, 4294959104  ;;  %v1534_v0 = vld [vmem:[%s1527_s24] sm:$0xff]  ;;  %v1537_v1 = vld [vmem:[%s1527_s24 + $0x8] sm:$0xff]  ;;  %s1624_s17 = scalar_lea.vmem [#allocation5], %s1134_s22  ;;  %s1145_s25 = sshll.u32 %s1457_s10, 9 }
  0x2a   : > { %v1540_v2 = vld [vmem:[%s1527_s24 + $0x10] sm:$0xff]  ;;  %1196 = vrsqrt.f32 %v1534_v0  ;;  %v1544_v3 = vld [vmem:[%s1527_s24 + $0x18] sm:$0xff]  ;;  %v1548_v4 = vld [vmem:[%s1527_s24 + $0x20] sm:$0xff]  ;;  %v214_v11 = vand.u32 2147483648, %v1534_v0  ;;  %vm211_vm0 = vcmp.eq.f32.partialorder %v1534_v0, inf  ;;  %v226_v14 = vand.u32 2147483648, %v1537_v1  ;;  %s1049_s27 = scalar_lea.hbm %s2525_s1, %s1145_s25 }
  0x2b   : > { %1198 = vrsqrt.f32 %v1537_v1  ;;  %v1552_v5 = vld [vmem:[%s1527_s24 + $0x28] sm:$0xff]  ;;  %v1556_v6 = vld [vmem:[%s1527_s24 + $0x30] sm:$0xff]  ;;  %v1560_v7 = vld [vmem:[%s1527_s24 + $0x38] sm:$0xff]  ;;  %v238_v15 = vand.u32 2147483648, %v1540_v2  ;;  %v250_v16 = vand.u32 2147483648, %v1544_v3  ;;  %vm213_vm1 = vcmp.eq.f32.partialorder %v1534_v0, 0.0 }
  0x2c   : > { %1200 = vrsqrt.f32 %v1540_v2  ;;  %v1573_v17 = vld [vmem:[%s1527_s24 + $0x40] sm:$0xff]  ;;  %vm223_vm2 = vcmp.eq.f32.partialorder %v1537_v1, inf  ;;  %v262_v21 = vand.u32 2147483648, %v1548_v4  ;;  %v274_v22 = vand.u32 2147483648, %v1552_v5  ;;  %v1581_v23 = vld [vmem:[%s1527_s24 + $0x48] sm:$0xff]  ;;  %s1050_s28 = sshll.u32 %s1624_s17, 4  ;;  %s1051_s28 = int_to_ptr.vmem [resolvable:$true] %s1050_s28 }
  0x2d   : > { %1202 = vrsqrt.f32 %v1544_v3  ;;  %vm225_vm3 = vcmp.eq.f32.partialorder %v1537_v1, 0.0  ;;  %vm235_vm4 = vcmp.eq.f32.partialorder %v1540_v2, inf  ;;  %v286_v27 = vand.u32 2147483648, %v1556_v6  ;;  %s1052_s29 = sshll.u32 %s1049_s27, 4  ;;  %s1037_s30 = scalar_lea.sflag [#allocation4], %s1521_s21  ;;  %s1053_s29 = int_to_ptr.hbm [resolvable:$true] %s1052_s29 }
  0x2e   : > { %1204 = vrsqrt.f32 %v1548_v4  ;;  %v298_v28 = vand.u32 2147483648, %v1560_v7  ;;  %vm237_vm5 = vcmp.eq.f32.partialorder %v1540_v2, 0.0  ;;  %vm247_vm6 = vcmp.eq.f32.partialorder %v1544_v3, inf  ;;  %s1368_s2 = sshra.s32 %s1053_s29, 4  ;;  %s1374_s11 = scalar_lea.hbm %s2525_s1, 2048  ;;  %s1369_s2 = int_to_ptr.hbm [resolvable:$true] %s1368_s2 }
  0x2f   : > { %1206 = vrsqrt.f32 %v1552_v5  ;;  %vm249_vm7 = vcmp.eq.f32.partialorder %v1544_v3, 0.0  ;;  %vm259_vm8 = vcmp.eq.f32.partialorder %v1548_v4, inf  ;;  %vm261_vm9 = vcmp.eq.f32.partialorder %v1548_v4, 0.0  ;;  %s1370_s3 = scalar_lea.hbm %s1369_s2, 512  ;;  %p1375_p0 = scmp.lt.s32.totalorder %s1369_s2, %s2525_s1 }
  0x30   : > { %v1197_v8 = vpop.eup %1196  ;;  %1208 = vrsqrt.f32 %v1556_v6  ;;  %vm271_vm10 = vcmp.eq.f32.partialorder %v1552_v5, inf  ;;  %vm273_vm11 = vcmp.eq.f32.partialorder %v1552_v5, 0.0  ;;  %vm283_vm12 = vcmp.eq.f32.partialorder %v1556_v6, inf  ;;  %p1371_p6 = scmp.ne.s32.totalorder %s1369_s2, %s1370_s3  ;;  %p1376_p2 = scmp.lt.s32.totalorder %s1374_s11, %s1370_s3 }
  0x31   : > { %v1199_v9 = vpop.eup %1198  ;;  %v205_v10 = vmul.f32 %v1197_v8, %v1534_v0  ;;  %1210 = vrsqrt.f32 %v1560_v7  ;;  %vm285_vm13 = vcmp.eq.f32.partialorder %v1556_v6, 0.0  ;;  %vm295_vm14 = vcmp.eq.f32.partialorder %v1560_v7, inf }
  0x32   : > { %v1201_v12 = vpop.eup %1200  ;;  %v217_v13 = vmul.f32 %v1199_v9, %v1537_v1  ;;  %1212 = vrsqrt.f32 %v1573_v17  ;;  %vm297_vm15 = vcmp.eq.f32.partialorder %v1560_v7, 0.0  ;;  %p1372_p12 = pnand %p1371_p6, %p1485_p10  ;;  %p1377_p3 = por %p1376_p2, %p1375_p0 }
  0x33   : > { %v1203_v18 = vpop.eup %1202  ;;  %v206_v19 = vmul.f32 %v1197_v8, %v205_v10  ;;  %v229_v20 = vmul.f32 %v1201_v12, %v1540_v2  ;;  %1214 = vrsqrt.f32 %v1581_v23 }
  0x34   : > { %v1205_v24 = vpop.eup %1204  ;;  %v218_v25 = vmul.f32 %v1199_v9, %v217_v13  ;;  %v241_v26 = vmul.f32 %v1203_v18, %v1544_v3  ;;  %p1373_p13 = pneg %p1372_p12 }
  0x35   : > { %v1207_v29 = vpop.eup %1206  ;;  %v207_v30 = vmul.f32 0.5, %v206_v19  ;;  %v230_v31 = vmul.f32 %v1201_v12, %v229_v20  ;;  %v253_v32 = vmul.f32 %v1205_v24, %v1548_v4 }
  0x36   : > { %v1209_v33 = vpop.eup %1208  ;;  %v219_v34 = vmul.f32 0.5, %v218_v25  ;;  %v242_v35 = vmul.f32 %v1203_v18, %v241_v26  ;;  %v265_v36 = vmul.f32 %v1207_v29, %v1552_v5  ;;  %p1378_p4 = pnand %p1377_p3, %p1373_p13 }
  0x37   : > { %v1211_v37 = vpop.eup %1210  ;;  %v208_v38 = vsub.f32 1.5, %v207_v30  ;;  %v231_v39 = vmul.f32 0.5, %v230_v31  ;;  %v254_v40 = vmul.f32 %v1205_v24, %v253_v32  ;;  %v277_v41 = vmul.f32 %v1209_v33, %v1556_v6  ;;  %v1645_v30 = vld [vmem:[%s1527_s24 + $0x50] sm:$0xff] }
  0x38   : > { %v220_v42 = vsub.f32 1.5, %v219_v34  ;;  %v243_v43 = vmul.f32 0.5, %v242_v35  ;;  %v266_v44 = vmul.f32 %v1207_v29, %v265_v36  ;;  %v289_v45 = vmul.f32 %v1211_v37, %v1560_v7  ;;  %v1603_v54 = vpop.eup %1212  ;;  %v1669_v35 = vld [vmem:[%s1527_s24 + $0x58] sm:$0xff] }
  0x39   : > { %v209_v46 = vmul.f32 %v1197_v8, %v208_v38  ;;  %v232_v47 = vsub.f32 1.5, %v231_v39  ;;  %v255_v48 = vmul.f32 0.5, %v254_v40  ;;  %v278_v49 = vmul.f32 %v1209_v33, %v277_v41  ;;  %v1607_v59 = vpop.eup %1214  ;;  %v1690_v38 = vld [vmem:[%s1527_s24 + $0x60] sm:$0xff]  ;;  %v1698_v41 = vld [vmem:[%s1527_s24 + $0x68] sm:$0xff] }
  0x3a   : > { %v221_v50 = vmul.f32 %v1199_v9, %v220_v42  ;;  %v244_v51 = vsub.f32 1.5, %v243_v43  ;;  %v267_v52 = vmul.f32 0.5, %v266_v44  ;;  %v290_v53 = vmul.f32 %v1211_v37, %v289_v45  ;;  %v1704_v43 = vld [vmem:[%s1527_s24 + $0x70] sm:$0xff] }
  0x3b   : > { %v210_v55 = vmul.f32 %v209_v46, %v1534_v0  ;;  %v233_v56 = vmul.f32 %v1201_v12, %v232_v47  ;;  %v256_v57 = vsub.f32 1.5, %v255_v48  ;;  %v279_v58 = vmul.f32 0.5, %v278_v49 }
  0x3c   : > { %v222_v60 = vmul.f32 %v221_v50, %v1537_v1  ;;  %v245_v61 = vmul.f32 %v1203_v18, %v244_v51  ;;  %v268_v62 = vsub.f32 1.5, %v267_v52  ;;  %v291_v63 = vmul.f32 0.5, %v290_v53 }
  0x3d   : > { %v212_v8 = vsel %vm211_vm0, %v1534_v0, %v210_v55  ;;  %v234_v9 = vmul.f32 %v233_v56, %v1540_v2  ;;  %v257_v10 = vmul.f32 %v1205_v24, %v256_v57  ;;  %v280_v12 = vsub.f32 1.5, %v279_v58  ;;  %v1727_v55 = vld [vmem:[%s1527_s24 + $0x80] sm:$0xff] }
  0x3e   : > { %v215_v13 = vsel %vm213_vm1, %v214_v11, %v212_v8  ;;  %v224_v18 = vsel %vm223_vm2, %v1537_v1, %v222_v60  ;;  %v246_v19 = vmul.f32 %v245_v61, %v1544_v3  ;;  %v269_v20 = vmul.f32 %v1207_v29, %v268_v62 }
  0x3f   : > { %972 = vst [vmem:[%s1624_s17] sm:$0xff] %v215_v13  ;;  %v227_v0 = vsel %vm225_vm3, %v226_v14, %v224_v18  ;;  %v236_v11 = vsel %vm235_vm4, %v1540_v2, %v234_v9  ;;  %v258_v24 = vmul.f32 %v257_v10, %v1548_v4  ;;  %v281_v25 = vmul.f32 %v1209_v33, %v280_v12 }
  0x40   : > { %973 = vst [vmem:[%s1624_s17 + $0x8] sm:$0xff] %v227_v0  ;;  %v239_v26 = vsel %vm237_vm5, %v238_v15, %v236_v11  ;;  %v248_v1 = vsel %vm247_vm6, %v1544_v3, %v246_v19  ;;  %v270_v14 = vmul.f32 %v269_v20, %v1552_v5  ;;  %v292_v29 = vsub.f32 1.5, %v291_v63  ;;  %v1742_v63 = vld [vmem:[%s1527_s24 + $0x88] sm:$0xff] }
  0x41   : > { %974 = vst [vmem:[%s1624_s17 + $0x10] sm:$0xff] %v239_v26  ;;  %v251_v31 = vsel %vm249_vm7, %v250_v16, %v248_v1  ;;  %v260_v2 = vsel %vm259_vm8, %v1548_v4, %v258_v24  ;;  %v282_v15 = vmul.f32 %v281_v25, %v1556_v6  ;;  %v301_v32 = vmul.f32 %v1603_v54, %v1573_v17 }
  0x42   : > { %975 = vst [vmem:[%s1624_s17 + $0x18] sm:$0xff] %v251_v31  ;;  %v263_v33 = vsel %vm261_vm9, %v262_v21, %v260_v2  ;;  %v272_v3 = vsel %vm271_vm10, %v1552_v5, %v270_v14  ;;  %v293_v16 = vmul.f32 %v1211_v37, %v292_v29  ;;  %v313_v34 = vmul.f32 %v1607_v59, %v1581_v23  ;;  %v1762_v14 = vld [vmem:[%s1527_s24 + $0x90] sm:$0xff] }
  0x43   : > { %976 = vst [vmem:[%s1624_s17 + $0x20] sm:$0xff] %v263_v33  ;;  %v275_v4 = vsel %vm273_vm11, %v274_v22, %v272_v3  ;;  %v284_v21 = vsel %vm283_vm12, %v1556_v6, %v282_v15  ;;  %v302_v36 = vmul.f32 %v1603_v54, %v301_v32  ;;  %1216 = vrsqrt.f32 %v1645_v30 }
  0x44   : > { %977 = vst [vmem:[%s1624_s17 + $0x28] sm:$0xff] %v275_v4  ;;  %v287_v37 = vsel %vm285_vm13, %v286_v27, %v284_v21  ;;  %v294_v5 = vmul.f32 %v293_v16, %v1560_v7  ;;  %v314_v22 = vmul.f32 %v1607_v59, %v313_v34  ;;  %1218 = vrsqrt.f32 %v1669_v35 }
  0x45   : > { %978 = vst [vmem:[%s1624_s17 + $0x30] sm:$0xff] %v287_v37  ;;  %v303_v39 = vmul.f32 0.5, %v302_v36  ;;  %1220 = vrsqrt.f32 %v1690_v38  ;;  %vm307_vm0 = vcmp.eq.f32.partialorder %v1573_v17, inf  ;;  %vm309_vm1 = vcmp.eq.f32.partialorder %v1573_v17, 0.0 }
  0x46   : > { %v296_v40 = vsel %vm295_vm14, %v1560_v7, %v294_v5  ;;  %v315_v6 = vmul.f32 0.5, %v314_v22  ;;  %v310_v47 = vand.u32 2147483648, %v1573_v17  ;;  %1222 = vrsqrt.f32 %v1698_v41  ;;  %v1713_v7 = vld [vmem:[%s1527_s24 + $0x78] sm:$0xff] }
  0x47   : > { %v299_v27 = vsel %vm297_vm15, %v298_v28, %v296_v40  ;;  %v304_v42 = vsub.f32 1.5, %v303_v39  ;;  %vm319_vm2 = vcmp.eq.f32.partialorder %v1581_v23, inf  ;;  %1224 = vrsqrt.f32 %v1704_v43 }
  0x48   : > { %979 = vst [vmem:[%s1624_s17 + $0x38] sm:$0xff] %v299_v27  ;;  %v316_v44 = vsub.f32 1.5, %v315_v6  ;;  %vm321_vm3 = vcmp.eq.f32.partialorder %v1581_v23, 0.0  ;;  %v322_v51 = vand.u32 2147483648, %v1581_v23  ;;  %vm331_vm4 = vcmp.eq.f32.partialorder %v1645_v30, inf }
  0x49   : > { %v1217_v45 = vpop.eup %1216  ;;  %v305_v46 = vmul.f32 %v1603_v54, %v304_v42  ;;  %1226 = vrsqrt.f32 %v1713_v7  ;;  %vm333_vm5 = vcmp.eq.f32.partialorder %v1645_v30, 0.0  ;;  %v334_v58 = vand.u32 2147483648, %v1645_v30 }
  0x4a   : > { %v317_v28 = vmul.f32 %v1607_v59, %v316_v44  ;;  %v325_v48 = vmul.f32 %v1217_v45, %v1645_v30  ;;  %v1219_v49 = vpop.eup %1218  ;;  %vm343_vm6 = vcmp.eq.f32.partialorder %v1669_v35, inf  ;;  %vm345_vm7 = vcmp.eq.f32.partialorder %v1669_v35, 0.0 }
  0x4b   : > { %v306_v50 = vmul.f32 %v305_v46, %v1573_v17  ;;  %v337_v54 = vmul.f32 %v1219_v49, %v1669_v35  ;;  %v1221_v56 = vpop.eup %1220  ;;  %v346_v10 = vand.u32 2147483648, %v1669_v35  ;;  %1228 = vrsqrt.f32 %v1727_v55 }
  0x4c   : > { %v318_v52 = vmul.f32 %v317_v28, %v1581_v23  ;;  %v326_v53 = vmul.f32 %v1217_v45, %v325_v48  ;;  %v1223_v8 = vpop.eup %1222  ;;  %vm355_vm8 = vcmp.eq.f32.partialorder %v1690_v38, inf  ;;  %v358_v19 = vand.u32 2147483648, %v1690_v38 }
  0x4d   : > { %v308_v57 = vsel %vm307_vm0, %v1573_v17, %v306_v50  ;;  %v338_v62 = vmul.f32 %v1219_v49, %v337_v54  ;;  %v349_v17 = vmul.f32 %v1221_v56, %v1690_v38  ;;  %v1225_v12 = vpop.eup %1224  ;;  %v361_v20 = vmul.f32 %v1223_v8, %v1698_v41 }
  0x4e   : > { %v311_v59 = vsel %vm309_vm1, %v310_v47, %v308_v57  ;;  %v320_v60 = vsel %vm319_vm2, %v1581_v23, %v318_v52  ;;  %v327_v61 = vmul.f32 0.5, %v326_v53  ;;  %vm357_vm9 = vcmp.eq.f32.partialorder %v1690_v38, 0.0 }
  0x4f   : > { %980 = vst [vmem:[%s1624_s17 + $0x40] sm:$0xff] %v311_v59  ;;  %v323_v9 = vsel %vm321_vm3, %v322_v51, %v320_v60  ;;  %v339_v18 = vmul.f32 0.5, %v338_v62  ;;  %v350_v0 = vmul.f32 %v1221_v56, %v349_v17  ;;  %vm367_vm10 = vcmp.eq.f32.partialorder %v1698_v41, inf  ;;  %v1227_v24 = vpop.eup %1226  ;;  %v1799_v62 = vld [vmem:[%s1527_s24 + $0x98] sm:$0xff] }
  0x50   : > { %981 = vst [vmem:[%s1624_s17 + $0x48] sm:$0xff] %v323_v9  ;;  %v328_v13 = vsub.f32 1.5, %v327_v61  ;;  %v370_v23 = vand.u32 2147483648, %v1698_v41  ;;  %v373_v11 = vmul.f32 %v1225_v12, %v1704_v43  ;;  %1230 = vrsqrt.f32 %v1742_v63 }
  0x51   : > { %v340_v26 = vsub.f32 1.5, %v339_v18  ;;  %v362_v1 = vmul.f32 %v1223_v8, %v361_v20  ;;  %vm369_vm11 = vcmp.eq.f32.partialorder %v1698_v41, 0.0  ;;  %vm379_vm12 = vcmp.eq.f32.partialorder %v1704_v43, inf  ;;  %v1229_v16 = vpop.eup %1228 }
  0x52   : > { %v329_v25 = vmul.f32 %v1217_v45, %v328_v13  ;;  %v351_v29 = vmul.f32 0.5, %v350_v0  ;;  %v374_v31 = vmul.f32 %v1225_v12, %v373_v11  ;;  %vm381_vm13 = vcmp.eq.f32.partialorder %v1704_v43, 0.0  ;;  %v1827_v11 = vld [vmem:[%s1527_s24 + $0xa8] sm:$0xff] }
  0x53   : > { %v382_v2 = vand.u32 2147483648, %v1704_v43  ;;  %v385_v15 = vmul.f32 %v1227_v24, %v1713_v7  ;;  %v341_v33 = vmul.f32 %v1219_v49, %v340_v26  ;;  %v363_v3 = vmul.f32 0.5, %v362_v1 }
  0x54   : > { %v330_v32 = vmul.f32 %v329_v25, %v1645_v30  ;;  %vm391_vm14 = vcmp.eq.f32.partialorder %v1713_v7, inf  ;;  %v352_v34 = vsub.f32 1.5, %v351_v29  ;;  %v375_v4 = vmul.f32 0.5, %v374_v31 }
  0x55   : > { %v386_v21 = vmul.f32 %v1227_v24, %v385_v15  ;;  %1232 = vrsqrt.f32 %v1762_v14  ;;  %v342_v37 = vmul.f32 %v341_v33, %v1669_v35  ;;  %v364_v5 = vsub.f32 1.5, %v363_v3 }
  0x56   : > { %v332_v36 = vsel %vm331_vm4, %v1645_v30, %v330_v32  ;;  %v397_v22 = vmul.f32 %v1229_v16, %v1727_v55  ;;  %v1231_v39 = vpop.eup %1230  ;;  %v353_v6 = vmul.f32 %v1221_v56, %v352_v34  ;;  %v376_v27 = vsub.f32 1.5, %v375_v4  ;;  %v1849_v32 = vld [vmem:[%s1527_s24 + $0xc0] sm:$0xff]  ;;  %v1857_v4 = vld [vmem:[%s1527_s24 + $0xc8] sm:$0xff] }
  0x57   : > { %v335_v40 = vsel %vm333_vm5, %v334_v58, %v332_v36  ;;  %v387_v42 = vmul.f32 0.5, %v386_v21  ;;  %v344_v44 = vsel %vm343_vm6, %v1669_v35, %v342_v37  ;;  %v365_v45 = vmul.f32 %v1223_v8, %v364_v5 }
  0x58   : > { %982 = vst [vmem:[%s1624_s17 + $0x50] sm:$0xff] %v335_v40  ;;  %v398_v46 = vmul.f32 %v1229_v16, %v397_v22  ;;  %v409_v47 = vmul.f32 %v1231_v39, %v1742_v63  ;;  %v347_v28 = vsel %vm345_vm7, %v346_v10, %v344_v44  ;;  %v354_v48 = vmul.f32 %v353_v6, %v1690_v38  ;;  %v1867_v22 = vld [vmem:[%s1527_s24 + $0xd0] sm:$0xff] }
  0x59   : > { %v377_v49 = vmul.f32 %v1225_v12, %v376_v27  ;;  %v388_v30 = vsub.f32 1.5, %v387_v42  ;;  %983 = vst [vmem:[%s1624_s17 + $0x58] sm:$0xff] %v347_v28  ;;  %v366_v50 = vmul.f32 %v365_v45, %v1698_v41  ;;  %vm393_vm15 = vcmp.eq.f32.partialorder %v1713_v7, 0.0 }
  0x5a   : > { %v399_v51 = vmul.f32 0.5, %v398_v46  ;;  %v410_v52 = vmul.f32 %v1231_v39, %v409_v47  ;;  %v356_v35 = vsel %vm355_vm8, %v1690_v38, %v354_v48  ;;  %v394_v57 = vand.u32 2147483648, %v1713_v7 }
  0x5b   : > { %v1233_v53 = vpop.eup %1232  ;;  %v378_v54 = vmul.f32 %v377_v49, %v1704_v43  ;;  %v389_v56 = vmul.f32 %v1227_v24, %v388_v30  ;;  %v359_v58 = vsel %vm357_vm9, %v358_v19, %v356_v35  ;;  %v368_v59 = vsel %vm367_vm10, %v1698_v41, %v366_v50  ;;  %v1814_v41 = vld [vmem:[%s1527_s24 + $0xa0] sm:$0xff]  ;;  %v1885_v50 = vld [vmem:[%s1527_s24 + $0xd8] sm:$0xff] }
  0x5c   : > { %v400_v60 = vsub.f32 1.5, %v399_v51  ;;  %v411_v61 = vmul.f32 0.5, %v410_v52  ;;  %984 = vst [vmem:[%s1624_s17 + $0x60] sm:$0xff] %v359_v58  ;;  %v371_v8 = vsel %vm369_vm11, %v370_v23, %v368_v59  ;;  %v421_v10 = vmul.f32 %v1233_v53, %v1762_v14 }
  0x5d   : > { %v380_v9 = vsel %vm379_vm12, %v1704_v43, %v378_v54  ;;  %v390_v38 = vmul.f32 %v389_v56, %v1713_v7  ;;  %985 = vst [vmem:[%s1624_s17 + $0x68] sm:$0xff] %v371_v8  ;;  %vm403_vm0 = vcmp.eq.f32.partialorder %v1727_v55, inf  ;;  %v406_v19 = vand.u32 2147483648, %v1727_v55 }
  0x5e   : > { %v383_v17 = vsel %vm381_vm13, %v382_v2, %v380_v9  ;;  %v401_v12 = vmul.f32 %v1229_v16, %v400_v60  ;;  %v412_v13 = vsub.f32 1.5, %v411_v61  ;;  %v422_v20 = vmul.f32 %v1233_v53, %v421_v10  ;;  %v1843_v2 = vld [vmem:[%s1527_s24 + $0xb8] sm:$0xff] }
  0x5f   : > { %986 = vst [vmem:[%s1624_s17 + $0x70] sm:$0xff] %v383_v17  ;;  %v392_v18 = vsel %vm391_vm14, %v1713_v7, %v390_v38  ;;  %1234 = vrsqrt.f32 %v1799_v62  ;;  %vm405_vm1 = vcmp.eq.f32.partialorder %v1727_v55, 0.0  ;;  %vm415_vm2 = vcmp.eq.f32.partialorder %v1742_v63, inf  ;;  %v1834_v7 = vld [vmem:[%s1527_s24 + $0xb0] sm:$0xff] }
  0x60   : > { %v395_v43 = vsel %vm393_vm15, %v394_v57, %v392_v18  ;;  %v402_v0 = vmul.f32 %v401_v12, %v1727_v55  ;;  %v413_v23 = vmul.f32 %v1231_v39, %v412_v13  ;;  %v418_v24 = vand.u32 2147483648, %v1742_v63 }
  0x61   : > { %987 = vst [vmem:[%s1624_s17 + $0x78] sm:$0xff] %v395_v43  ;;  %v423_v25 = vmul.f32 0.5, %v422_v20  ;;  %1236 = vrsqrt.f32 %v1814_v41  ;;  %vm417_vm3 = vcmp.eq.f32.partialorder %v1742_v63, 0.0  ;;  %vm427_vm4 = vcmp.eq.f32.partialorder %v1762_v14, inf }
  0x62   : > { %v404_v26 = vsel %vm403_vm0, %v1727_v55, %v402_v0  ;;  %v414_v1 = vmul.f32 %v413_v23, %v1742_v63  ;;  %1238 = vrsqrt.f32 %v1827_v11  ;;  %v430_v16 = vand.u32 2147483648, %v1762_v14 }
  0x63   : > { %v407_v29 = vsel %vm405_vm1, %v406_v19, %v404_v26  ;;  %v424_v31 = vsub.f32 1.5, %v423_v25  ;;  %1240 = vrsqrt.f32 %v1834_v7  ;;  %vm429_vm5 = vcmp.eq.f32.partialorder %v1762_v14, 0.0 }
  0x64   : > { %988 = vst [vmem:[%s1624_s17 + $0x80] sm:$0xff] %v407_v29  ;;  %v416_v15 = vsel %vm415_vm2, %v1742_v63, %v414_v1  ;;  %1242 = vrsqrt.f32 %v1843_v2  ;;  %vm439_vm6 = vcmp.eq.f32.partialorder %v1799_v62, inf  ;;  %vm441_vm7 = vcmp.eq.f32.partialorder %v1799_v62, 0.0 }
  0x65   : > { %v1235_v33 = vpop.eup %1234  ;;  %v419_v55 = vsel %vm417_vm3, %v418_v24, %v416_v15  ;;  %v425_v3 = vmul.f32 %v1233_v53, %v424_v31  ;;  %1244 = vrsqrt.f32 %v1849_v32  ;;  %v442_v37 = vand.u32 2147483648, %v1799_v62 }
  0x66   : > { %989 = vst [vmem:[%s1624_s17 + $0x88] sm:$0xff] %v419_v55  ;;  %v433_v34 = vmul.f32 %v1235_v33, %v1799_v62  ;;  %vm451_vm8 = vcmp.eq.f32.partialorder %v1814_v41, inf  ;;  %v454_v6 = vand.u32 2147483648, %v1814_v41  ;;  %1246 = vrsqrt.f32 %v1857_v4 }
  0x67   : > { %v1237_v63 = vpop.eup %1236  ;;  %v426_v21 = vmul.f32 %v425_v3, %v1762_v14  ;;  %vm453_vm9 = vcmp.eq.f32.partialorder %v1814_v41, 0.0  ;;  %vm463_vm10 = vcmp.eq.f32.partialorder %v1827_v11, inf  ;;  %1248 = vrsqrt.f32 %v1867_v22 }
  0x68   : > { %v434_v36 = vmul.f32 %v1235_v33, %v433_v34  ;;  %v445_v5 = vmul.f32 %v1237_v63, %v1814_v41  ;;  %v1239_v39 = vpop.eup %1238  ;;  %vm465_vm11 = vcmp.eq.f32.partialorder %v1827_v11, 0.0  ;;  %vm475_vm12 = vcmp.eq.f32.partialorder %v1834_v7, inf }
  0x69   : > { %v428_v40 = vsel %vm427_vm4, %v1762_v14, %v426_v21  ;;  %v1241_v27 = vpop.eup %1240  ;;  %v457_v46 = vmul.f32 %v1239_v39, %v1827_v11  ;;  %v466_v14 = vand.u32 2147483648, %v1827_v11  ;;  %vm477_vm13 = vcmp.eq.f32.partialorder %v1834_v7, 0.0 }
  0x6a   : > { %v431_v42 = vsel %vm429_vm5, %v430_v16, %v428_v40  ;;  %v435_v44 = vmul.f32 0.5, %v434_v36  ;;  %v446_v45 = vmul.f32 %v1237_v63, %v445_v5  ;;  %v469_v47 = vmul.f32 %v1241_v27, %v1834_v7  ;;  %v1243_v28 = vpop.eup %1242 }
  0x6b   : > { %990 = vst [vmem:[%s1624_s17 + $0x90] sm:$0xff] %v431_v42  ;;  %v458_v30 = vmul.f32 %v1239_v39, %v457_v46  ;;  %v1245_v51 = vpop.eup %1244  ;;  %v478_v53 = vand.u32 2147483648, %v1834_v7  ;;  %v481_v35 = vmul.f32 %v1243_v28, %v1843_v2  ;;  %v490_v54 = vand.u32 2147483648, %v1843_v2 }
  0x6c   : > { %v436_v48 = vsub.f32 1.5, %v435_v44  ;;  %v447_v49 = vmul.f32 0.5, %v446_v45  ;;  %v470_v52 = vmul.f32 %v1241_v27, %v469_v47  ;;  %vm487_vm14 = vcmp.eq.f32.partialorder %v1843_v2, inf  ;;  %v1247_v60 = vpop.eup %1246 }
  0x6d   : > { %v459_v58 = vmul.f32 0.5, %v458_v30  ;;  %v493_v59 = vmul.f32 %v1245_v51, %v1849_v32  ;;  %v482_v8 = vmul.f32 %v1243_v28, %v481_v35  ;;  %vm489_vm15 = vcmp.eq.f32.partialorder %v1843_v2, 0.0  ;;  %v1249_v12 = vpop.eup %1248 }
  0x6e   : > { %v437_v56 = vmul.f32 %v1235_v33, %v436_v48  ;;  %v448_v57 = vsub.f32 1.5, %v447_v49  ;;  %v471_v61 = vmul.f32 0.5, %v470_v52  ;;  %vm499_vm0 = vcmp.eq.f32.partialorder %v1849_v32, inf }
  0x6f   : > { %1250 = vrsqrt.f32 %v1885_v50  ;;  %v460_v10 = vsub.f32 1.5, %v459_v58  ;;  %v494_v17 = vmul.f32 %v1245_v51, %v493_v59  ;;  %vm501_vm1 = vcmp.eq.f32.partialorder %v1849_v32, 0.0 }
  0x70   : > { %v438_v9 = vmul.f32 %v437_v56, %v1799_v62  ;;  %v449_v38 = vmul.f32 %v1237_v63, %v448_v57  ;;  %v472_v13 = vsub.f32 1.5, %v471_v61  ;;  %v483_v18 = vmul.f32 0.5, %v482_v8 }
  0x71   : > { %v502_v19 = vand.u32 2147483648, %v1849_v32  ;;  %v505_v20 = vmul.f32 %v1247_v60, %v1857_v4  ;;  %v461_v23 = vmul.f32 %v1239_v39, %v460_v10  ;;  %v495_v24 = vmul.f32 0.5, %v494_v17  ;;  %v1924_v39 = vld [vmem:[%s1527_s24 + $0xe0] sm:$0xff]  ;;  %v1987_v10 = vld [vmem:[%s1527_s24 + $0x108] sm:$0xff] }
  0x72   : > { %v440_v43 = vsel %vm439_vm6, %v1799_v62, %v438_v9  ;;  %v450_v0 = vmul.f32 %v449_v38, %v1814_v41  ;;  %vm511_vm2 = vcmp.eq.f32.partialorder %v1857_v4, inf  ;;  %v473_v26 = vmul.f32 %v1241_v27, %v472_v13 }
  0x73   : > { %v443_v25 = vsel %vm441_vm7, %v442_v37, %v440_v43  ;;  %v484_v1 = vsub.f32 1.5, %v483_v18  ;;  %v506_v29 = vmul.f32 %v1247_v60, %v505_v20  ;;  %v462_v15 = vmul.f32 %v461_v23, %v1827_v11 }
  0x74   : > { %991 = vst [vmem:[%s1624_s17 + $0x98] sm:$0xff] %v443_v25  ;;  %v452_v31 = vsel %vm451_vm8, %v1814_v41, %v450_v0  ;;  %v496_v33 = vsub.f32 1.5, %v495_v24  ;;  %v517_v55 = vmul.f32 %v1249_v12, %v1867_v22  ;;  %v474_v16 = vmul.f32 %v473_v26, %v1834_v7 }
  0x75   : > { %v1251_v3 = vpop.eup %1250  ;;  %v455_v62 = vsel %vm453_vm9, %v454_v6, %v452_v31  ;;  %v485_v34 = vmul.f32 %v1243_v28, %v484_v1  ;;  %v507_v63 = vmul.f32 0.5, %v506_v29  ;;  %v464_v21 = vsel %vm463_vm10, %v1827_v11, %v462_v15  ;;  %v1945_v28 = vld [vmem:[%s1527_s24 + $0xe8] sm:$0xff] }
  0x76   : > { %992 = vst [vmem:[%s1624_s17 + $0xa0] sm:$0xff] %v455_v62  ;;  %v497_v36 = vmul.f32 %v1245_v51, %v496_v33  ;;  %v518_v37 = vmul.f32 %v1249_v12, %v517_v55  ;;  %v529_v5 = vmul.f32 %v1251_v3, %v1885_v50  ;;  %v467_v41 = vsel %vm465_vm11, %v466_v14, %v464_v21  ;;  %v2015_v33 = vld [vmem:[%s1527_s24 + $0x120] sm:$0xff] }
  0x77   : > { %v476_v40 = vsel %vm475_vm12, %v1834_v7, %v474_v16  ;;  %v486_v6 = vmul.f32 %v485_v34, %v1843_v2  ;;  %v508_v27 = vsub.f32 1.5, %v507_v63  ;;  %993 = vst [vmem:[%s1624_s17 + $0xa8] sm:$0xff] %v467_v41  ;;  %v514_v47 = vand.u32 2147483648, %v1857_v4 }
  0x78   : > { %v479_v42 = vsel %vm477_vm13, %v478_v53, %v476_v40  ;;  %v498_v44 = vmul.f32 %v497_v36, %v1849_v32  ;;  %v519_v45 = vmul.f32 0.5, %v518_v37  ;;  %v530_v46 = vmul.f32 %v1251_v3, %v529_v5  ;;  %v1960_v53 = vld [vmem:[%s1527_s24 + $0xf0] sm:$0xff] }
  0x79   : > { %994 = vst [vmem:[%s1624_s17 + $0xb0] sm:$0xff] %v479_v42  ;;  %v488_v11 = vsel %vm487_vm14, %v1843_v2, %v486_v6  ;;  %v509_v14 = vmul.f32 %v1247_v60, %v508_v27  ;;  %1252 = vrsqrt.f32 %v1924_v39  ;;  %vm513_vm3 = vcmp.eq.f32.partialorder %v1857_v4, 0.0  ;;  %v1976_v60 = vld [vmem:[%s1527_s24 + $0x100] sm:$0xff] }
  0x7a   : > { %v491_v7 = vsel %vm489_vm15, %v490_v54, %v488_v11  ;;  %v500_v48 = vsel %vm499_vm0, %v1849_v32, %v498_v44  ;;  %v520_v49 = vsub.f32 1.5, %v519_v45  ;;  %v531_v30 = vmul.f32 0.5, %v530_v46  ;;  %v1965_v54 = vld [vmem:[%s1527_s24 + $0xf8] sm:$0xff] }
  0x7b   : > { %995 = vst [vmem:[%s1624_s17 + $0xb8] sm:$0xff] %v491_v7  ;;  %v503_v51 = vsel %vm501_vm1, %v502_v19, %v500_v48  ;;  %v510_v52 = vmul.f32 %v509_v14, %v1857_v4  ;;  %1254 = vrsqrt.f32 %v1945_v28  ;;  %vm523_vm4 = vcmp.eq.f32.partialorder %v1867_v22, inf  ;;  %v1995_v19 = vld [vmem:[%s1527_s24 + $0x110] sm:$0xff] }
  0x7c   : > { %996 = vst [vmem:[%s1624_s17 + $0xc0] sm:$0xff] %v503_v51  ;;  %v521_v2 = vmul.f32 %v1249_v12, %v520_v49  ;;  %v532_v35 = vsub.f32 1.5, %v531_v30  ;;  %vm525_vm5 = vcmp.eq.f32.partialorder %v1867_v22, 0.0  ;;  %v526_v56 = vand.u32 2147483648, %v1867_v22 }
  0x7d   : > { %v512_v32 = vsel %vm511_vm2, %v1857_v4, %v510_v52  ;;  %1256 = vrsqrt.f32 %v1960_v53  ;;  %vm535_vm6 = vcmp.eq.f32.partialorder %v1885_v50, inf  ;;  %v538_v4 = vand.u32 2147483648, %v1885_v50 }
  0x7e   : > { %v515_v57 = vsel %vm513_vm3, %v514_v47, %v512_v32  ;;  %v522_v58 = vmul.f32 %v521_v2, %v1867_v22  ;;  %v533_v59 = vmul.f32 %v1251_v3, %v532_v35  ;;  %1258 = vrsqrt.f32 %v1965_v54 }
  0x7f   : > { %v1253_v61 = vpop.eup %1252  ;;  %997 = vst [vmem:[%s1624_s17 + $0xc8] sm:$0xff] %v515_v57  ;;  %vm537_vm7 = vcmp.eq.f32.partialorder %v1885_v50, 0.0  ;;  %1260 = vrsqrt.f32 %v1976_v60  ;;  %vm547_vm8 = vcmp.eq.f32.partialorder %v1924_v39, inf  ;;  %vm549_vm9 = vcmp.eq.f32.partialorder %v1924_v39, 0.0 }
  0x80   : > { %v524_v8 = vsel %vm523_vm4, %v1867_v22, %v522_v58  ;;  %v534_v9 = vmul.f32 %v533_v59, %v1885_v50  ;;  %v541_v38 = vmul.f32 %v1253_v61, %v1924_v39  ;;  %1262 = vrsqrt.f32 %v1987_v10 }
  0x81   : > { %v527_v17 = vsel %vm525_vm5, %v526_v56, %v524_v8  ;;  %v1255_v12 = vpop.eup %1254  ;;  %v550_v23 = vand.u32 2147483648, %v1924_v39  ;;  %vm559_vm10 = vcmp.eq.f32.partialorder %v1945_v28, inf  ;;  %vm561_vm11 = vcmp.eq.f32.partialorder %v1945_v28, 0.0 }
  0x82   : > { %998 = vst [vmem:[%s1624_s17 + $0xd0] sm:$0xff] %v527_v17  ;;  %v536_v13 = vsel %vm535_vm6, %v1885_v50, %v534_v9  ;;  %v542_v18 = vmul.f32 %v1253_v61, %v541_v38  ;;  %v553_v43 = vmul.f32 %v1255_v12, %v1945_v28  ;;  %v2005_v50 = vld [vmem:[%s1527_s24 + $0x118] sm:$0xff]  ;;  %v562_v26 = vand.u32 2147483648, %v1945_v28 }
  0x83   : > { %v539_v20 = vsel %vm537_vm7, %v538_v4, %v536_v13  ;;  %v1257_v0 = vpop.eup %1256  ;;  %1264 = vrsqrt.f32 %v1995_v19  ;;  %vm571_vm12 = vcmp.eq.f32.partialorder %v1960_v53, inf  ;;  %v574_v31 = vand.u32 2147483648, %v1960_v53 }
  0x84   : > { %999 = vst [vmem:[%s1624_s17 + $0xd8] sm:$0xff] %v539_v20  ;;  %v543_v22 = vmul.f32 0.5, %v542_v18  ;;  %v1259_v24 = vpop.eup %1258  ;;  %v554_v25 = vmul.f32 %v1255_v12, %v553_v43  ;;  %v565_v1 = vmul.f32 %v1257_v0, %v1960_v53  ;;  %vm573_vm13 = vcmp.eq.f32.partialorder %v1960_v53, 0.0  ;;  %v2054_v20 = vld [vmem:[%s1527_s24 + $0x128] sm:$0xff] }
  0x85   : > { %v577_v15 = vmul.f32 %v1259_v24, %v1965_v54  ;;  %v1261_v55 = vpop.eup %1260  ;;  %vm583_vm14 = vcmp.eq.f32.partialorder %v1965_v54, inf  ;;  %1266 = vrsqrt.f32 %v2005_v50  ;;  %vm585_vm15 = vcmp.eq.f32.partialorder %v1965_v54, 0.0 }
  0x86   : > { %v544_v29 = vsub.f32 1.5, %v543_v22  ;;  %v555_v3 = vmul.f32 0.5, %v554_v25  ;;  %v566_v62 = vmul.f32 %v1257_v0, %v565_v1  ;;  %v586_v63 = vand.u32 2147483648, %v1965_v54  ;;  %v1263_v36 = vpop.eup %1262  ;;  %v2066_v1 = vld [vmem:[%s1527_s24 + $0x130] sm:$0xff] }
  0x87   : > { %v578_v34 = vmul.f32 %v1259_v24, %v577_v15  ;;  %v589_v21 = vmul.f32 %v1261_v55, %v1976_v60  ;;  %vm595_vm0 = vcmp.eq.f32.partialorder %v1976_v60, inf  ;;  %1268 = vrsqrt.f32 %v2015_v33 }
  0x88   : > { %v545_v16 = vmul.f32 %v1253_v61, %v544_v29  ;;  %v556_v37 = vsub.f32 1.5, %v555_v3  ;;  %v567_v5 = vmul.f32 0.5, %v566_v62  ;;  %vm597_vm1 = vcmp.eq.f32.partialorder %v1976_v60, 0.0  ;;  %v2078_v3 = vld [vmem:[%s1527_s24 + $0x138] sm:$0xff] }
  0x89   : > { %v579_v40 = vmul.f32 0.5, %v578_v34  ;;  %v590_v6 = vmul.f32 %v1261_v55, %v589_v21  ;;  %v601_v27 = vmul.f32 %v1263_v36, %v1987_v10  ;;  %v1265_v42 = vpop.eup %1264  ;;  %v598_v46 = vand.u32 2147483648, %v1976_v60 }
  0x8a   : > { %v546_v41 = vmul.f32 %v545_v16, %v1924_v39  ;;  %v557_v44 = vmul.f32 %v1255_v12, %v556_v37  ;;  %v568_v45 = vsub.f32 1.5, %v567_v5  ;;  %vm607_vm2 = vcmp.eq.f32.partialorder %v1987_v10, inf }
  0x8b   : > { %v580_v14 = vsub.f32 1.5, %v579_v40  ;;  %v591_v47 = vmul.f32 0.5, %v590_v6  ;;  %v602_v7 = vmul.f32 %v1263_v36, %v601_v27  ;;  %vm609_vm3 = vcmp.eq.f32.partialorder %v1987_v10, 0.0  ;;  %v1267_v48 = vpop.eup %1266  ;;  %v2103_v40 = vld [vmem:[%s1527_s24 + $0x148] sm:$0xff] }
  0x8c   : > { %v548_v11 = vsel %vm547_vm8, %v1924_v39, %v546_v41  ;;  %v558_v30 = vmul.f32 %v557_v44, %v1945_v28  ;;  %v569_v51 = vmul.f32 %v1257_v0, %v568_v45  ;;  %v613_v52 = vmul.f32 %v1265_v42, %v1995_v19 }
  0x8d   : > { %v551_v49 = vsel %vm549_vm9, %v550_v23, %v548_v11  ;;  %v581_v2 = vmul.f32 %v1259_v24, %v580_v14  ;;  %v592_v35 = vsub.f32 1.5, %v591_v47  ;;  %v603_v32 = vmul.f32 0.5, %v602_v7  ;;  %v1269_v57 = vpop.eup %1268  ;;  %v2116_v11 = vld [vmem:[%s1527_s24 + $0x150] sm:$0xff] }
  0x8e   : > { %1000 = vst [vmem:[%s1624_s17 + $0xe0] sm:$0xff] %v551_v49  ;;  %v625_v56 = vmul.f32 %v1267_v48, %v2005_v50  ;;  %v560_v58 = vsel %vm559_vm10, %v1945_v28, %v558_v30  ;;  %v570_v39 = vmul.f32 %v569_v51, %v1960_v53  ;;  %v610_v59 = vand.u32 2147483648, %v1987_v10 }
  0x8f   : > { %v614_v61 = vmul.f32 %v1265_v42, %v613_v52  ;;  %v563_v4 = vsel %vm561_vm11, %v562_v26, %v560_v58  ;;  %v582_v8 = vmul.f32 %v581_v2, %v1965_v54  ;;  %v593_v9 = vmul.f32 %v1261_v55, %v592_v35  ;;  %v2133_v35 = vld [vmem:[%s1527_s24 + $0x160] sm:$0xff] }
  0x90   : > { %v604_v38 = vsub.f32 1.5, %v603_v32  ;;  %1001 = vst [vmem:[%s1624_s17 + $0xe8] sm:$0xff] %v563_v4  ;;  %v572_v17 = vsel %vm571_vm12, %v1960_v53, %v570_v39  ;;  %v626_v13 = vmul.f32 %v1267_v48, %v625_v56  ;;  %v637_v18 = vmul.f32 %v1269_v57, %v2015_v33 }
  0x91   : > { %v615_v12 = vmul.f32 0.5, %v614_v61  ;;  %v575_v28 = vsel %vm573_vm13, %v574_v31, %v572_v17  ;;  %v584_v43 = vsel %vm583_vm14, %v1965_v54, %v582_v8  ;;  %v594_v0 = vmul.f32 %v593_v9, %v1976_v60  ;;  %v2141_v61 = vld [vmem:[%s1527_s24 + $0x168] sm:$0xff] }
  0x92   : > { %v605_v22 = vmul.f32 %v1263_v36, %v604_v38  ;;  %1002 = vst [vmem:[%s1624_s17 + $0xf0] sm:$0xff] %v575_v28  ;;  %v587_v23 = vsel %vm585_vm15, %v586_v63, %v584_v43  ;;  %v627_v25 = vmul.f32 0.5, %v626_v13  ;;  %v638_v26 = vmul.f32 %v1269_v57, %v637_v18  ;;  %v2091_v36 = vld [vmem:[%s1527_s24 + $0x140] sm:$0xff] }
  0x93   : > { %v616_v24 = vsub.f32 1.5, %v615_v12  ;;  %1003 = vst [vmem:[%s1624_s17 + $0xf8] sm:$0xff] %v587_v23  ;;  %v596_v53 = vsel %vm595_vm0, %v1976_v60, %v594_v0  ;;  %vm619_vm4 = vcmp.eq.f32.partialorder %v1995_v19, inf  ;;  %1270 = vrsqrt.f32 %v2054_v20 }
  0x94   : > { %v606_v29 = vmul.f32 %v605_v22, %v1987_v10  ;;  %v599_v54 = vsel %vm597_vm1, %v598_v46, %v596_v53  ;;  %v628_v15 = vsub.f32 1.5, %v627_v25  ;;  %v639_v55 = vmul.f32 0.5, %v638_v26 }
  0x95   : > { %v617_v31 = vmul.f32 %v1265_v42, %v616_v24  ;;  %1004 = vst [vmem:[%s1624_s17 + $0x100] sm:$0xff] %v599_v54  ;;  %vm621_vm5 = vcmp.eq.f32.partialorder %v1995_v19, 0.0  ;;  %v622_v16 = vand.u32 2147483648, %v1995_v19  ;;  %1272 = vrsqrt.f32 %v2066_v1 }
  0x96   : > { %v608_v62 = vsel %vm607_vm2, %v1987_v10, %v606_v29  ;;  %v629_v63 = vmul.f32 %v1267_v48, %v628_v15  ;;  %v640_v21 = vsub.f32 1.5, %v639_v55  ;;  %vm631_vm6 = vcmp.eq.f32.partialorder %v2005_v50, inf  ;;  %v2124_v48 = vld [vmem:[%s1527_s24 + $0x158] sm:$0xff] }
  0x97   : > { %v611_v60 = vsel %vm609_vm3, %v610_v59, %v608_v62  ;;  %v618_v34 = vmul.f32 %v617_v31, %v1995_v19  ;;  %v634_v37 = vand.u32 2147483648, %v2005_v50  ;;  %1274 = vrsqrt.f32 %v2078_v3 }
  0x98   : > { %1005 = vst [vmem:[%s1624_s17 + $0x108] sm:$0xff] %v611_v60  ;;  %v630_v5 = vmul.f32 %v629_v63, %v2005_v50  ;;  %vm633_vm7 = vcmp.eq.f32.partialorder %v2005_v50, 0.0  ;;  %v641_v41 = vmul.f32 %v1269_v57, %v640_v21  ;;  %vm643_vm8 = vcmp.eq.f32.partialorder %v2015_v33, inf }
  0x99   : > { %v620_v10 = vsel %vm619_vm4, %v1995_v19, %v618_v34  ;;  %v1271_v6 = vpop.eup %1270  ;;  %v646_v42 = vand.u32 2147483648, %v2015_v33  ;;  %1276 = vrsqrt.f32 %v2091_v36  ;;  %vm645_vm9 = vcmp.eq.f32.partialorder %v2015_v33, 0.0 }
  0x9a   : > { %v623_v27 = vsel %vm621_vm5, %v622_v16, %v620_v10  ;;  %v632_v44 = vsel %vm631_vm6, %v2005_v50, %v630_v5  ;;  %v642_v45 = vmul.f32 %v641_v41, %v2015_v33  ;;  %v649_v46 = vmul.f32 %v1271_v6, %v2054_v20 }
  0x9b   : > { %1006 = vst [vmem:[%s1624_s17 + $0x110] sm:$0xff] %v623_v27  ;;  %v1273_v19 = vpop.eup %1272  ;;  %v635_v14 = vsel %vm633_vm7, %v634_v37, %v632_v44  ;;  %1278 = vrsqrt.f32 %v2103_v40  ;;  %vm655_vm10 = vcmp.eq.f32.partialorder %v2054_v20, inf  ;;  %vm657_vm11 = vcmp.eq.f32.partialorder %v2054_v20, 0.0 }
  0x9c   : > { %1007 = vst [vmem:[%s1624_s17 + $0x118] sm:$0xff] %v635_v14  ;;  %v644_v47 = vsel %vm643_vm8, %v2015_v33, %v642_v45  ;;  %v650_v7 = vmul.f32 %v1271_v6, %v649_v46  ;;  %v661_v50 = vmul.f32 %v1273_v19, %v2066_v1  ;;  %v658_v51 = vand.u32 2147483648, %v2054_v20 }
  0x9d   : > { %v1275_v49 = vpop.eup %1274  ;;  %v647_v30 = vsel %vm645_vm9, %v646_v42, %v644_v47  ;;  %1280 = vrsqrt.f32 %v2116_v11  ;;  %vm667_vm12 = vcmp.eq.f32.partialorder %v2066_v1, inf  ;;  %vm669_vm13 = vcmp.eq.f32.partialorder %v2066_v1, 0.0 }
  0x9e   : > { %1008 = vst [vmem:[%s1624_s17 + $0x120] sm:$0xff] %v647_v30  ;;  %v651_v52 = vmul.f32 0.5, %v650_v7  ;;  %v662_v2 = vmul.f32 %v1273_v19, %v661_v50  ;;  %v673_v33 = vmul.f32 %v1275_v49, %v2078_v3  ;;  %v670_v56 = vand.u32 2147483648, %v2066_v1  ;;  %v2183_v50 = vld [vmem:[%s1527_s24 + $0x170] sm:$0xff] }
  0x9f   : > { %v1277_v32 = vpop.eup %1276  ;;  %vm679_vm14 = vcmp.eq.f32.partialorder %v2078_v3, inf  ;;  %1282 = vrsqrt.f32 %v2124_v48  ;;  %vm681_vm15 = vcmp.eq.f32.partialorder %v2078_v3, 0.0  ;;  %v682_v8 = vand.u32 2147483648, %v2078_v3 }
  0xa0   : > { %v652_v57 = vsub.f32 1.5, %v651_v52  ;;  %v663_v58 = vmul.f32 0.5, %v662_v2  ;;  %v674_v39 = vmul.f32 %v1275_v49, %v673_v33  ;;  %v685_v59 = vmul.f32 %v1277_v32, %v2091_v36 }
  0xa1   : > { %v1279_v4 = vpop.eup %1278  ;;  %vm691_vm0 = vcmp.eq.f32.partialorder %v2091_v36, inf  ;;  %1284 = vrsqrt.f32 %v2133_v35  ;;  %vm693_vm1 = vcmp.eq.f32.partialorder %v2091_v36, 0.0  ;;  %v694_v18 = vand.u32 2147483648, %v2091_v36 }
  0xa2   : > { %v653_v9 = vmul.f32 %v1271_v6, %v652_v57  ;;  %v664_v38 = vsub.f32 1.5, %v663_v58  ;;  %v675_v17 = vmul.f32 0.5, %v674_v39  ;;  %v686_v12 = vmul.f32 %v1277_v32, %v685_v59  ;;  %v2197_v57 = vld [vmem:[%s1527_s24 + $0x178] sm:$0xff] }
  0xa3   : > { %v1281_v13 = vpop.eup %1280  ;;  %v697_v28 = vmul.f32 %v1279_v4, %v2103_v40  ;;  %1286 = vrsqrt.f32 %v2141_v61  ;;  %vm703_vm2 = vcmp.eq.f32.partialorder %v2103_v40, inf  ;;  %vm705_vm3 = vcmp.eq.f32.partialorder %v2103_v40, 0.0 }
  0xa4   : > { %v654_v43 = vmul.f32 %v653_v9, %v2054_v20  ;;  %v665_v0 = vmul.f32 %v1273_v19, %v664_v38  ;;  %v676_v22 = vsub.f32 1.5, %v675_v17  ;;  %v687_v23 = vmul.f32 0.5, %v686_v12  ;;  %v2208_v38 = vld [vmem:[%s1527_s24 + $0x180] sm:$0xff] }
  0xa5   : > { %v1283_v24 = vpop.eup %1282  ;;  %v698_v25 = vmul.f32 %v1279_v4, %v697_v28  ;;  %v706_v26 = vand.u32 2147483648, %v2103_v40  ;;  %v709_v53 = vmul.f32 %v1281_v13, %v2116_v11  ;;  %v718_v29 = vand.u32 2147483648, %v2116_v11 }
  0xa6   : > { %v656_v54 = vsel %vm655_vm10, %v2054_v20, %v654_v43  ;;  %v666_v31 = vmul.f32 %v665_v0, %v2066_v1  ;;  %v677_v15 = vmul.f32 %v1275_v49, %v676_v22  ;;  %v688_v55 = vsub.f32 1.5, %v687_v23  ;;  %v2222_v43 = vld [vmem:[%s1527_s24 + $0x188] sm:$0xff] }
  0xa7   : > { %vm715_vm4 = vcmp.eq.f32.partialorder %v2116_v11, inf  ;;  %v1285_v62 = vpop.eup %1284  ;;  %v659_v16 = vsel %vm657_vm11, %v658_v51, %v656_v54  ;;  %v699_v60 = vmul.f32 0.5, %v698_v25  ;;  %v710_v34 = vmul.f32 %v1281_v13, %v709_v53 }
  0xa8   : > { %vm717_vm5 = vcmp.eq.f32.partialorder %v2116_v11, 0.0  ;;  %v721_v63 = vmul.f32 %v1283_v24, %v2124_v48  ;;  %1009 = vst [vmem:[%s1624_s17 + $0x128] sm:$0xff] %v659_v16  ;;  %v668_v21 = vsel %vm667_vm12, %v2066_v1, %v666_v31  ;;  %v678_v37 = vmul.f32 %v677_v15, %v2078_v3  ;;  %v2258_v16 = vld [vmem:[%s1527_s24 + $0x1a8] sm:$0xff] }
  0xa9   : > { %v689_v10 = vmul.f32 %v1277_v32, %v688_v55  ;;  %v733_v5 = vmul.f32 %v1285_v62, %v2133_v35  ;;  %v1287_v20 = vpop.eup %1286  ;;  %v671_v41 = vsel %vm669_vm13, %v670_v56, %v668_v21  ;;  %v700_v6 = vsub.f32 1.5, %v699_v60  ;;  %v2251_v55 = vld [vmem:[%s1527_s24 + $0x1a0] sm:$0xff] }
  0xaa   : > { %v711_v27 = vmul.f32 0.5, %v710_v34  ;;  %v722_v42 = vmul.f32 %v1283_v24, %v721_v63  ;;  %1010 = vst [vmem:[%s1624_s17 + $0x130] sm:$0xff] %v671_v41  ;;  %v680_v44 = vsel %vm679_vm14, %v2078_v3, %v678_v37  ;;  %v745_v19 = vmul.f32 %v1287_v20, %v2141_v61  ;;  %v2267_v37 = vld [vmem:[%s1527_s24 + $0x1b0] sm:$0xff] }
  0xab   : > { %v690_v45 = vmul.f32 %v689_v10, %v2091_v36  ;;  %v734_v46 = vmul.f32 %v1285_v62, %v733_v5  ;;  %v683_v14 = vsel %vm681_vm15, %v682_v8, %v680_v44  ;;  %v701_v47 = vmul.f32 %v1279_v4, %v700_v6 }
  0xac   : > { %v712_v1 = vsub.f32 1.5, %v711_v27  ;;  %v723_v7 = vmul.f32 0.5, %v722_v42  ;;  %1011 = vst [vmem:[%s1624_s17 + $0x138] sm:$0xff] %v683_v14  ;;  %vm727_vm6 = vcmp.eq.f32.partialorder %v2124_v48, inf  ;;  %v746_v51 = vmul.f32 %v1287_v20, %v745_v19 }
  0xad   : > { %v692_v49 = vsel %vm691_vm0, %v2091_v36, %v690_v45  ;;  %v735_v30 = vmul.f32 0.5, %v734_v46  ;;  %v702_v3 = vmul.f32 %v701_v47, %v2103_v40  ;;  %vm729_vm7 = vcmp.eq.f32.partialorder %v2124_v48, 0.0 }
  0xae   : > { %v695_v52 = vsel %vm693_vm1, %v694_v18, %v692_v49  ;;  %v713_v2 = vmul.f32 %v1281_v13, %v712_v1  ;;  %v724_v33 = vsub.f32 1.5, %v723_v7  ;;  %v747_v56 = vmul.f32 0.5, %v746_v51 }
  0xaf   : > { %1012 = vst [vmem:[%s1624_s17 + $0x140] sm:$0xff] %v695_v52  ;;  %v736_v32 = vsub.f32 1.5, %v735_v30  ;;  %1288 = vrsqrt.f32 %v2183_v50  ;;  %v704_v36 = vsel %vm703_vm2, %v2103_v40, %v702_v3  ;;  %v730_v59 = vand.u32 2147483648, %v2124_v48 }
  0xb0   : > { %v714_v58 = vmul.f32 %v713_v2, %v2116_v11  ;;  %v725_v39 = vmul.f32 %v1283_v24, %v724_v33  ;;  %v707_v4 = vsel %vm705_vm3, %v706_v26, %v704_v36  ;;  %vm739_vm8 = vcmp.eq.f32.partialorder %v2133_v35, inf  ;;  %v2239_v26 = vld [vmem:[%s1527_s24 + $0x190] sm:$0xff] }
  0xb1   : > { %v737_v8 = vmul.f32 %v1285_v62, %v736_v32  ;;  %v748_v9 = vsub.f32 1.5, %v747_v56  ;;  %1013 = vst [vmem:[%s1624_s17 + $0x148] sm:$0xff] %v707_v4  ;;  %v742_v13 = vand.u32 2147483648, %v2133_v35  ;;  %1290 = vrsqrt.f32 %v2197_v57 }
  0xb2   : > { %v716_v17 = vsel %vm715_vm4, %v2116_v11, %v714_v58  ;;  %v726_v12 = vmul.f32 %v725_v39, %v2124_v48  ;;  %vm741_vm9 = vcmp.eq.f32.partialorder %v2133_v35, 0.0  ;;  %vm751_vm10 = vcmp.eq.f32.partialorder %v2141_v61, inf }
  0xb3   : > { %v719_v40 = vsel %vm717_vm5, %v718_v29, %v716_v17  ;;  %v738_v18 = vmul.f32 %v737_v8, %v2133_v35  ;;  %v749_v28 = vmul.f32 %v1287_v20, %v748_v9  ;;  %v754_v11 = vand.u32 2147483648, %v2141_v61 }
  0xb4   : > { %1014 = vst [vmem:[%s1624_s17 + $0x150] sm:$0xff] %v719_v40  ;;  %v728_v0 = vsel %vm727_vm6, %v2124_v48, %v726_v12  ;;  %1292 = vrsqrt.f32 %v2208_v38  ;;  %vm753_vm11 = vcmp.eq.f32.partialorder %v2141_v61, 0.0  ;;  %v2245_v48 = vld [vmem:[%s1527_s24 + $0x198] sm:$0xff]  ;;  %vm763_vm12 = vcmp.eq.f32.partialorder %v2183_v50, inf }
  0xb5   : > { %v1289_v22 = vpop.eup %1288  ;;  %v731_v23 = vsel %vm729_vm7, %v730_v59, %v728_v0  ;;  %v740_v24 = vsel %vm739_vm8, %v2133_v35, %v738_v18  ;;  %v750_v25 = vmul.f32 %v749_v28, %v2141_v61  ;;  %1294 = vrsqrt.f32 %v2222_v43 }
  0xb6   : > { %1015 = vst [vmem:[%s1624_s17 + $0x158] sm:$0xff] %v731_v23  ;;  %v743_v53 = vsel %vm741_vm9, %v742_v13, %v740_v24  ;;  %v757_v29 = vmul.f32 %v1289_v22, %v2183_v50  ;;  %1296 = vrsqrt.f32 %v2239_v26  ;;  %vm765_vm13 = vcmp.eq.f32.partialorder %v2183_v50, 0.0 }
  0xb7   : > { %1016 = vst [vmem:[%s1624_s17 + $0x160] sm:$0xff] %v743_v53  ;;  %v752_v54 = vsel %vm751_vm10, %v2141_v61, %v750_v25  ;;  %v1291_v35 = vpop.eup %1290  ;;  %1298 = vrsqrt.f32 %v2245_v48  ;;  %v766_v61 = vand.u32 2147483648, %v2183_v50  ;;  %vm775_vm14 = vcmp.eq.f32.partialorder %v2197_v57, inf }
  0xb8   : > { %v755_v31 = vsel %vm753_vm11, %v754_v11, %v752_v54  ;;  %v758_v15 = vmul.f32 %v1289_v22, %v757_v29  ;;  %v769_v62 = vmul.f32 %v1291_v35, %v2197_v57  ;;  %vm777_vm15 = vcmp.eq.f32.partialorder %v2197_v57, 0.0  ;;  %v2308_v54 = vld [vmem:[%s1527_s24 + $0x1b8] sm:$0xff] }
  0xb9   : > { %1017 = vst [vmem:[%s1624_s17 + $0x168] sm:$0xff] %v755_v31  ;;  %1300 = vrsqrt.f32 %v2251_v55  ;;  %v778_v20 = vand.u32 2147483648, %v2197_v57  ;;  %vm787_vm0 = vcmp.eq.f32.partialorder %v2208_v38, inf  ;;  %vm789_vm1 = vcmp.eq.f32.partialorder %v2208_v38, 0.0 }
  0xba   : > { %v1293_v60 = vpop.eup %1292  ;;  %v759_v34 = vmul.f32 0.5, %v758_v15  ;;  %v770_v63 = vmul.f32 %v1291_v35, %v769_v62  ;;  %1302 = vrsqrt.f32 %v2258_v16  ;;  %v790_v27 = vand.u32 2147483648, %v2208_v38 }
  0xbb   : > { %v781_v21 = vmul.f32 %v1293_v60, %v2208_v38  ;;  %v1295_v10 = vpop.eup %1294  ;;  %vm799_vm2 = vcmp.eq.f32.partialorder %v2222_v43, inf  ;;  %v802_v46 = vand.u32 2147483648, %v2222_v43  ;;  %1304 = vrsqrt.f32 %v2267_v37 }
  0xbc   : > { %v760_v5 = vsub.f32 1.5, %v759_v34  ;;  %v771_v41 = vmul.f32 0.5, %v770_v63  ;;  %v793_v42 = vmul.f32 %v1295_v10, %v2222_v43  ;;  %v1297_v44 = vpop.eup %1296  ;;  %vm801_vm3 = vcmp.eq.f32.partialorder %v2222_v43, 0.0 }
  0xbd   : > { %v782_v6 = vmul.f32 %v1293_v60, %v781_v21  ;;  %v1299_v19 = vpop.eup %1298  ;;  %v805_v7 = vmul.f32 %v1297_v44, %v2239_v26  ;;  %v814_v30 = vand.u32 2147483648, %v2239_v26  ;;  %v826_v52 = vand.u32 2147483648, %v2245_v48 }
  0xbe   : > { %v761_v45 = vmul.f32 %v1289_v22, %v760_v5  ;;  %v772_v14 = vsub.f32 1.5, %v771_v41  ;;  %v794_v1 = vmul.f32 %v1295_v10, %v793_v42  ;;  %v817_v51 = vmul.f32 %v1299_v19, %v2245_v48  ;;  %v2330_v42 = vld [vmem:[%s1527_s24 + $0x1c0] sm:$0xff] }
  0xbf   : > { %v783_v47 = vmul.f32 0.5, %v782_v6  ;;  %v1301_v3 = vpop.eup %1300  ;;  %v806_v56 = vmul.f32 %v1297_v44, %v805_v7  ;;  %vm811_vm4 = vcmp.eq.f32.partialorder %v2239_v26, inf  ;;  %vm823_vm5 = vcmp.eq.f32.partialorder %v2245_v48, inf  ;;  %v2349_v7 = vld [vmem:[%s1527_s24 + $0x1c8] sm:$0xff] }
  0xc0   : > { %v762_v49 = vmul.f32 %v761_v45, %v2183_v50  ;;  %v773_v2 = vmul.f32 %v1291_v35, %v772_v14  ;;  %v795_v32 = vmul.f32 0.5, %v794_v1  ;;  %v1303_v36 = vpop.eup %1302  ;;  %vm813_vm6 = vcmp.eq.f32.partialorder %v2239_v26, 0.0 }
  0xc1   : > { %v784_v33 = vsub.f32 1.5, %v783_v47  ;;  %v818_v39 = vmul.f32 %v1299_v19, %v817_v51  ;;  %vm825_vm7 = vcmp.eq.f32.partialorder %v2245_v48, 0.0  ;;  %v829_v59 = vmul.f32 %v1301_v3, %v2251_v55  ;;  %v1305_v13 = vpop.eup %1304 }
  0xc2   : > { %v764_v58 = vsel %vm763_vm12, %v2183_v50, %v762_v49  ;;  %v838_v4 = vand.u32 2147483648, %v2251_v55  ;;  %v774_v9 = vmul.f32 %v773_v2, %v2197_v57  ;;  %v796_v12 = vsub.f32 1.5, %v795_v32 }
  0xc3   : > { %v767_v8 = vsel %vm765_vm13, %v766_v61, %v764_v58  ;;  %v785_v17 = vmul.f32 %v1293_v60, %v784_v33  ;;  %vm835_vm8 = vcmp.eq.f32.partialorder %v2251_v55, inf  ;;  %v807_v40 = vmul.f32 0.5, %v806_v56  ;;  %v2373_v33 = vld [vmem:[%s1527_s24 + $0x1d8] sm:$0xff]  ;;  %v2381_v56 = vld [vmem:[%s1527_s24 + $0x1e0] sm:$0xff] }
  0xc4   : > { %1018 = vst [vmem:[%s1624_s17 + $0x170] sm:$0xff] %v767_v8  ;;  %v819_v18 = vmul.f32 0.5, %v818_v39  ;;  %v830_v28 = vmul.f32 %v1301_v3, %v829_v59  ;;  %vm837_vm9 = vcmp.eq.f32.partialorder %v2251_v55, 0.0  ;;  %v841_v0 = vmul.f32 %v1303_v36, %v2258_v16  ;;  %v2388_v59 = vld [vmem:[%s1527_s24 + $0x1e8] sm:$0xff] }
  0xc5   : > { %v776_v50 = vsel %vm775_vm14, %v2197_v57, %v774_v9  ;;  %v786_v11 = vmul.f32 %v785_v17, %v2208_v38  ;;  %v797_v22 = vmul.f32 %v1295_v10, %v796_v12  ;;  %v853_v23 = vmul.f32 %v1305_v13, %v2267_v37 }
  0xc6   : > { %v779_v24 = vsel %vm777_vm15, %v778_v20, %v776_v50  ;;  %v808_v25 = vsub.f32 1.5, %v807_v40  ;;  %v820_v53 = vsub.f32 1.5, %v819_v18  ;;  %v831_v29 = vmul.f32 0.5, %v830_v28 }
  0xc7   : > { %1019 = vst [vmem:[%s1624_s17 + $0x178] sm:$0xff] %v779_v24  ;;  %v788_v35 = vsel %vm787_vm0, %v2208_v38, %v786_v11  ;;  %v798_v31 = vmul.f32 %v797_v22, %v2222_v43  ;;  %v842_v15 = vmul.f32 %v1303_v36, %v841_v0  ;;  %v854_v62 = vmul.f32 %v1305_v13, %v853_v23 }
  0xc8   : > { %v791_v60 = vsel %vm789_vm1, %v790_v27, %v788_v35  ;;  %v809_v57 = vmul.f32 %v1297_v44, %v808_v25  ;;  %v821_v34 = vmul.f32 %v1299_v19, %v820_v53  ;;  %v832_v61 = vsub.f32 1.5, %v831_v29 }
  0xc9   : > { %1020 = vst [vmem:[%s1624_s17 + $0x180] sm:$0xff] %v791_v60  ;;  %v800_v63 = vsel %vm799_vm2, %v2222_v43, %v798_v31  ;;  %v843_v21 = vmul.f32 0.5, %v842_v15  ;;  %v855_v10 = vmul.f32 0.5, %v854_v62  ;;  %1306 = vrsqrt.f32 %v2308_v54 }
  0xca   : > { %v803_v5 = vsel %vm801_vm3, %v802_v46, %v800_v63  ;;  %v810_v20 = vmul.f32 %v809_v57, %v2239_v26  ;;  %v822_v38 = vmul.f32 %v821_v34, %v2245_v48  ;;  %v833_v41 = vmul.f32 %v1301_v3, %v832_v61 }
  0xcb   : > { %1021 = vst [vmem:[%s1624_s17 + $0x188] sm:$0xff] %v803_v5  ;;  %v844_v6 = vsub.f32 1.5, %v843_v21  ;;  %vm847_vm10 = vcmp.eq.f32.partialorder %v2258_v16, inf  ;;  %vm849_vm11 = vcmp.eq.f32.partialorder %v2258_v16, 0.0  ;;  %v856_v27 = vsub.f32 1.5, %v855_v10 }
  0xcc   : > { %v812_v43 = vsel %vm811_vm4, %v2239_v26, %v810_v20  ;;  %v824_v44 = vsel %vm823_vm5, %v2245_v48, %v822_v38  ;;  %v834_v45 = vmul.f32 %v833_v41, %v2251_v55  ;;  %v850_v46 = vand.u32 2147483648, %v2258_v16  ;;  %v2359_v48 = vld [vmem:[%s1527_s24 + $0x1d0] sm:$0xff] }
  0xcd   : > { %v815_v19 = vsel %vm813_vm6, %v814_v30, %v812_v43  ;;  %v827_v14 = vsel %vm825_vm7, %v826_v52, %v824_v44  ;;  %v845_v47 = vmul.f32 %v1303_v36, %v844_v6  ;;  %v857_v1 = vmul.f32 %v1305_v13, %v856_v27  ;;  %v2402_v13 = vld [vmem:[%s1527_s24 + $0x1f8] sm:$0xff] }
  0xce   : > { %1022 = vst [vmem:[%s1624_s17 + $0x190] sm:$0xff] %v815_v19  ;;  %v836_v49 = vsel %vm835_vm8, %v2251_v55, %v834_v45  ;;  %vm859_vm12 = vcmp.eq.f32.partialorder %v2267_v37, inf  ;;  %v862_v26 = vand.u32 2147483648, %v2267_v37  ;;  %1308 = vrsqrt.f32 %v2330_v42 }
  0xcf   : > { %v1307_v30 = vpop.eup %1306  ;;  %1023 = vst [vmem:[%s1624_s17 + $0x198] sm:$0xff] %v827_v14  ;;  %v839_v51 = vsel %vm837_vm9, %v838_v4, %v836_v49  ;;  %v846_v52 = vmul.f32 %v845_v47, %v2258_v16  ;;  %v858_v3 = vmul.f32 %v857_v1, %v2267_v37  ;;  %vm861_vm13 = vcmp.eq.f32.partialorder %v2267_v37, 0.0 }
  0xd0   : > { %1024 = vst [vmem:[%s1624_s17 + $0x1a0] sm:$0xff] %v839_v51  ;;  %v865_v2 = vmul.f32 %v1307_v30, %v2308_v54  ;;  %1310 = vrsqrt.f32 %v2349_v7  ;;  %vm871_vm14 = vcmp.eq.f32.partialorder %v2308_v54, inf  ;;  %vm873_vm15 = vcmp.eq.f32.partialorder %v2308_v54, 0.0 }
  0xd1   : > { %v848_v55 = vsel %vm847_vm10, %v2258_v16, %v846_v52  ;;  %v860_v32 = vsel %vm859_vm12, %v2267_v37, %v858_v3  ;;  %1312 = vrsqrt.f32 %v2359_v48  ;;  %v2393_v37 = vld [vmem:[%s1527_s24 + $0x1f0] sm:$0xff]  ;;  %v874_v12 = vand.u32 2147483648, %v2308_v54 }
  0xd2   : > { %v851_v36 = vsel %vm849_vm11, %v850_v46, %v848_v55  ;;  %v863_v58 = vsel %vm861_vm13, %v862_v26, %v860_v32  ;;  %v866_v39 = vmul.f32 %v1307_v30, %v865_v2  ;;  %1314 = vrsqrt.f32 %v2373_v33 }
  0xd3   : > { %1025 = vst [vmem:[%s1624_s17 + $0x1a8] sm:$0xff] %v851_v36  ;;  %1316 = vrsqrt.f32 %v2381_v56  ;;  %vm883_vm0 = vcmp.eq.f32.partialorder %v2330_v42, inf  ;;  %vm885_vm1 = vcmp.eq.f32.partialorder %v2330_v42, 0.0  ;;  %v886_v28 = vand.u32 2147483648, %v2330_v42 }
  0xd4   : > { %v1309_v4 = vpop.eup %1308  ;;  %1026 = vst [vmem:[%s1624_s17 + $0x1b0] sm:$0xff] %v863_v58  ;;  %v867_v8 = vmul.f32 0.5, %v866_v39  ;;  %1318 = vrsqrt.f32 %v2388_v59  ;;  %vm895_vm2 = vcmp.eq.f32.partialorder %v2349_v7, inf  ;;  %v898_v11 = vand.u32 2147483648, %v2349_v7 }
  0xd5   : > { %v877_v16 = vmul.f32 %v1309_v4, %v2330_v42  ;;  %1320 = vrsqrt.f32 %v2393_v37  ;;  %vm897_vm3 = vcmp.eq.f32.partialorder %v2349_v7, 0.0  ;;  %vm907_vm4 = vcmp.eq.f32.partialorder %v2359_v48, inf }
  0xd6   : > { %v1311_v9 = vpop.eup %1310  ;;  %v868_v17 = vsub.f32 1.5, %v867_v8  ;;  %1322 = vrsqrt.f32 %v2402_v13  ;;  %vm909_vm5 = vcmp.eq.f32.partialorder %v2359_v48, 0.0  ;;  %v910_v31 = vand.u32 2147483648, %v2359_v48 }
  0xd7   : > { %v1313_v40 = vpop.eup %1312  ;;  %v878_v18 = vmul.f32 %v1309_v4, %v877_v16  ;;  %v889_v0 = vmul.f32 %v1311_v9, %v2349_v7  ;;  %vm919_vm6 = vcmp.eq.f32.partialorder %v2373_v33, inf  ;;  %v922_v57 = vand.u32 2147483648, %v2373_v33 }
  0xd8   : > { %v869_v50 = vmul.f32 %v1307_v30, %v868_v17  ;;  %v901_v22 = vmul.f32 %v1313_v40, %v2359_v48  ;;  %v1315_v23 = vpop.eup %1314  ;;  %vm921_vm7 = vcmp.eq.f32.partialorder %v2373_v33, 0.0  ;;  %vm931_vm8 = vcmp.eq.f32.partialorder %v2381_v56, inf }
  0xd9   : > { %v879_v24 = vmul.f32 0.5, %v878_v18  ;;  %v890_v25 = vmul.f32 %v1311_v9, %v889_v0  ;;  %v1317_v53 = vpop.eup %1316  ;;  %v913_v15 = vmul.f32 %v1315_v23, %v2373_v33  ;;  %v934_v5 = vand.u32 2147483648, %v2381_v56 }
  0xda   : > { %v870_v29 = vmul.f32 %v869_v50, %v2308_v54  ;;  %v902_v35 = vmul.f32 %v1313_v40, %v901_v22  ;;  %v925_v34 = vmul.f32 %v1317_v53, %v2381_v56  ;;  %v1319_v61 = vpop.eup %1318  ;;  %vm933_vm9 = vcmp.eq.f32.partialorder %v2381_v56, 0.0 }
  0xdb   : > { %v880_v62 = vsub.f32 1.5, %v879_v24  ;;  %v891_v60 = vmul.f32 0.5, %v890_v25  ;;  %v914_v10 = vmul.f32 %v1315_v23, %v913_v15  ;;  %v1321_v20 = vpop.eup %1320  ;;  %v937_v45 = vmul.f32 %v1319_v61, %v2388_v59 }
  0xdc   : > { %v872_v63 = vsel %vm871_vm14, %v2308_v54, %v870_v29  ;;  %v903_v21 = vmul.f32 0.5, %v902_v35  ;;  %v926_v27 = vmul.f32 %v1317_v53, %v925_v34  ;;  %v949_v46 = vmul.f32 %v1321_v20, %v2393_v37  ;;  %v1323_v19 = vpop.eup %1322 }
  0xdd   : > { %v875_v38 = vsel %vm873_vm15, %v874_v12, %v872_v63  ;;  %v881_v41 = vmul.f32 %v1309_v4, %v880_v62  ;;  %v892_v6 = vsub.f32 1.5, %v891_v60  ;;  %v915_v44 = vmul.f32 0.5, %v914_v10 }
  0xde   : > { %1027 = vst [vmem:[%s1624_s17 + $0x1b8] sm:$0xff] %v875_v38  ;;  %v904_v43 = vsub.f32 1.5, %v903_v21  ;;  %v927_v1 = vmul.f32 0.5, %v926_v27  ;;  %vm943_vm10 = vcmp.eq.f32.partialorder %v2388_v59, inf  ;;  %v938_v26 = vmul.f32 %v1319_v61, %v937_v45 }
  0xdf   : > { %v882_v14 = vmul.f32 %v881_v41, %v2330_v42  ;;  %v893_v47 = vmul.f32 %v1311_v9, %v892_v6  ;;  %v916_v49 = vsub.f32 1.5, %v915_v44  ;;  %v950_v30 = vmul.f32 %v1321_v20, %v949_v46 }
  0xe0   : > { %v905_v54 = vmul.f32 %v1313_v40, %v904_v43  ;;  %v928_v3 = vsub.f32 1.5, %v927_v1  ;;  %v961_v2 = vmul.f32 %v1323_v19, %v2402_v13  ;;  %v939_v58 = vmul.f32 0.5, %v938_v26 }
  0xe1   : > { %v884_v51 = vsel %vm883_vm0, %v2330_v42, %v882_v14  ;;  %v894_v52 = vmul.f32 %v893_v47, %v2349_v7  ;;  %v917_v36 = vmul.f32 %v1315_v23, %v916_v49  ;;  %v951_v8 = vmul.f32 0.5, %v950_v30 }
  0xe2   : > { %v887_v55 = vsel %vm885_vm1, %v886_v28, %v884_v51  ;;  %v906_v32 = vmul.f32 %v905_v54, %v2359_v48  ;;  %v929_v4 = vmul.f32 %v1317_v53, %v928_v3  ;;  %v962_v16 = vmul.f32 %v1323_v19, %v961_v2 }
  0xe3   : > { %1028 = vst [vmem:[%s1624_s17 + $0x1c0] sm:$0xff] %v887_v55  ;;  %v896_v39 = vsel %vm895_vm2, %v2349_v7, %v894_v52  ;;  %v918_v17 = vmul.f32 %v917_v36, %v2373_v33  ;;  %v940_v12 = vsub.f32 1.5, %v939_v58  ;;  %v952_v28 = vsub.f32 1.5, %v951_v8 }
  0xe4   : > { %v899_v9 = vsel %vm897_vm3, %v898_v11, %v896_v39  ;;  %v908_v42 = vsel %vm907_vm4, %v2359_v48, %v906_v32  ;;  %v930_v18 = vmul.f32 %v929_v4, %v2381_v56  ;;  %v963_v0 = vmul.f32 0.5, %v962_v16 }
  0xe5   : > { %1029 = vst [vmem:[%s1624_s17 + $0x1c8] sm:$0xff] %v899_v9  ;;  %v911_v40 = vsel %vm909_vm5, %v910_v31, %v908_v42  ;;  %v920_v7 = vsel %vm919_vm6, %v2373_v33, %v918_v17  ;;  %v941_v50 = vmul.f32 %v1319_v61, %v940_v12  ;;  %vm945_vm11 = vcmp.eq.f32.partialorder %v2388_v59, 0.0 }
  0xe6   : > { %1030 = vst [vmem:[%s1624_s17 + $0x1d0] sm:$0xff] %v911_v40  ;;  %v946_v11 = vand.u32 2147483648, %v2388_v59  ;;  %v923_v48 = vsel %vm921_vm7, %v922_v57, %v920_v7  ;;  %v932_v22 = vsel %vm931_vm8, %v2381_v56, %v930_v18  ;;  %v953_v23 = vmul.f32 %v1321_v20, %v952_v28 }
  0xe7   : > { %v964_v24 = vsub.f32 1.5, %v963_v0  ;;  %1031 = vst [vmem:[%s1624_s17 + $0x1d8] sm:$0xff] %v923_v48  ;;  %v935_v25 = vsel %vm933_vm9, %v934_v5, %v932_v22  ;;  %v942_v53 = vmul.f32 %v941_v50, %v2388_v59  ;;  %vm955_vm12 = vcmp.eq.f32.partialorder %v2393_v37, inf }
  0xe8   : > { %v958_v29 = vand.u32 2147483648, %v2393_v37  ;;  %1032 = vst [vmem:[%s1624_s17 + $0x1e0] sm:$0xff] %v935_v25  ;;  %v954_v33 = vmul.f32 %v953_v23, %v2393_v37  ;;  %vm957_vm13 = vcmp.eq.f32.partialorder %v2393_v37, 0.0  ;;  %vm967_vm14 = vcmp.eq.f32.partialorder %v2402_v13, inf }
  0xe9   : > { %v965_v35 = vmul.f32 %v1323_v19, %v964_v24  ;;  %v944_v56 = vsel %vm943_vm10, %v2388_v59, %v942_v53  ;;  %v970_v31 = vand.u32 2147483648, %v2402_v13  ;;  %vm969_vm15 = vcmp.eq.f32.partialorder %v2402_v13, 0.0 }
  0xea   : > { %v947_v15 = vsel %vm945_vm11, %v946_v11, %v944_v56  ;;  %v956_v62 = vsel %vm955_vm12, %v2393_v37, %v954_v33 }
  0xeb   : > { %v966_v60 = vmul.f32 %v965_v35, %v2402_v13  ;;  %1033 = vst [vmem:[%s1624_s17 + $0x1e8] sm:$0xff] %v947_v15  ;;  %v959_v57 = vsel %vm957_vm13, %v958_v29, %v956_v62 }
  0xec   : > { %1034 = vst [vmem:[%s1624_s17 + $0x1f0] sm:$0xff] %v959_v57 }
  0xed   : > { %v968_v34 = vsel %vm967_vm14, %v2402_v13, %v966_v60 }
  0xee   : > { %v971_v61 = vsel %vm969_vm15, %v970_v31, %v968_v34 }
  0xef   : > { %1035 = vst [vmem:[%s1624_s17 + $0x1f8] sm:$0xff] %v971_v61 }
  0xf0   : > { %1381 = shalt.err (!%p1378_p4)
}
  0xf1   : > { %s1424_s16 = smov 512   ;;  %s1425_s20 = smov 32  }
  0xf2   : > { %1148 = dma.vmem_to_hbm [thread:$0]  (%p1485_p10), %s1051_s28, 8192, %s1053_s29, %s1037_s30, %s1424_s16, %s1424_s16, %s1425_s20  }
  0xf3 PF: > { %p1159_p5 = scmp.ge.s32.totalorder %s1420_s9, 2  ;;  %s1067_s21 = sand.u32 1, %s1408_s6  }
  0xf4   : > { %s1068_s22 = scalar_lea.sflag [#allocation4], %s1067_s21 }
  0xf5   : > { %p1155_p7 = pnand %p1159_p5, %p1489_p11 }
  0xf7   : > { %p1156_p8 = pneg %p1155_p7 }
  0xf9   : > { %1403 = dma.done.wait (%p1156_p8), %s1068_s22, 8192  }
  0xfa   : > { %1405 = vsyncadd (%p1156_p8), %s1068_s22, 4294959104  ;;  %p14_p9 = scmp.ge.s32.totalorder %s1461_s12, 6   ;;  %s2531_s6 = smov %s1412_s7 }
  0xfb   : > { %s2532_s7 = smov %s1416_s8  ;;  %s2533_s8 = smov %s1473_s15 }
  0xfc   : > { %s2534_s9 = smov %s1461_s12  ;;  %16 = sbr.rel (!%p14_p9) target bundleno = 5 (0x5), region = 69 }
 0x101   :  { %1074 = vsyncpa [#allocation3], 1 }
 0x102   :  { %1076 = vsyncpa [#allocation3 + $0x1], 1 }
 0x103   :  { %1077 = vsyncpa [#allocation4], 1 }
 0x104   :  { %1079 = vsyncpa [#allocation4 + $0x1], 1 }

</bundles_post_ra>
